<compile_context>
chip_gen: v7x
topology: tpu7x:2x2x1
jax: 0.10.0
libtpu: 0.0.40
codegen_flags: <defaults>
</compile_context>

<pallas_src>
import math
from functools import partial

import jax
import jax.numpy as jnp
from jax.experimental import pallas as pl
from jax.experimental.pallas import tpu as pltpu

_VMEM_LIMIT = 32 * 1024 * 1024  # explicit scoped-VMEM budget, safe on v5e/v6e/v7x


# ----------------------------- in-kernel helpers ---------------------------- #

def _erf(x):
    # Abramowitz & Stegun 7.1.26 polynomial erf (max abs err ~1.5e-7 ~= f32 eps).
    # TODO(synk): switch to jax.lax.erf if/when Mosaic provides a direct lowering.
    ax = jnp.abs(x)
    t = 1.0 / (1.0 + 0.3275911 * ax)
    poly = ((((1.061405429 * t - 1.453152027) * t + 1.421413741) * t
             - 0.284496736) * t + 0.254829592) * t
    y = 1.0 - poly * jnp.exp(-ax * ax)
    return jnp.where(x < 0, -y, y)


def _layer_norm(x, g, b):
    mean = jnp.mean(x, axis=-1, keepdims=True)
    var = jnp.mean((x - mean) * (x - mean), axis=-1, keepdims=True)
    return (x - mean) * jax.lax.rsqrt(var + 1e-5) * g + b


def _softmax_rows(s):
    m = jnp.max(s, axis=-1, keepdims=True)
    p = jnp.exp(s - m)
    # denominator reciprocal on the (otherwise idle) EUP slot instead of a VPU divide
    return p * pl.reciprocal(jnp.sum(p, axis=-1, keepdims=True), approx=True)


# ----------------------------- fused block kernels --------------------------- #

def _make_self_attn_block_kernel(H, scale):
    """LN1 + QKV proj + MHA (no logits out) + out proj + residual; one batch/tile."""
    def kernel(x_ref, g_ref, b_ref, wqkv_ref, wo_ref, o_ref):
        x = x_ref[0].astype(jnp.float32)                       # (T, C)
        C = x.shape[1]
        hd = C // H
        xn = _layer_norm(x, g_ref[...], b_ref[...])
        qkv = jnp.dot(xn, wqkv_ref[...],
                      preferred_element_type=jnp.float32)      # (T, 3C), bias=False
        heads = []
        for h in range(H):                                     # static loop, H small
            q_h = qkv[:, h * hd:(h + 1) * hd] * scale
            k_h = qkv[:, C + h * hd:C + (h + 1) * hd]
            v_h = qkv[:, 2 * C + h * hd:2 * C + (h + 1) * hd]
            s = jax.lax.dot_general(q_h, k_h, (((1,), (1,)), ((), ())),
                                    preferred_element_type=jnp.float32)   # (T, T)
            p = _softmax_rows(s)
            heads.append(jnp.dot(p, v_h, preferred_element_type=jnp.float32))
        attn = jnp.concatenate(heads, axis=-1)                 # (T, C) lane-dense
        y = jnp.dot(attn, wo_ref[...], preferred_element_type=jnp.float32)
        o_ref[0] = (x + y).astype(o_ref.dtype)                 # residual add fused
    return kernel


def _make_cross_attn_block_kernel(H, scale):
    """LN2 + Q/K/V proj + MHA + out proj + residual; emits pre-softmax logits."""
    def kernel(x_ref, e_ref, g_ref, b_ref, wq_ref, wk_ref, wv_ref, wo_ref,
               o_ref, logits_ref):
        x = x_ref[0].astype(jnp.float32)                       # (T, C)
        e = e_ref[0].astype(jnp.float32)                       # (S, C)
        C = x.shape[1]
        hd = C // H
        xn = _layer_norm(x, g_ref[...], b_ref[...])
        q = jnp.dot(xn, wq_ref[...], preferred_element_type=jnp.float32)  # (T, C)
        k = jnp.dot(e, wk_ref[...], preferred_element_type=jnp.float32)   # (S, C)
        v = jnp.dot(e, wv_ref[...], preferred_element_type=jnp.float32)   # (S, C)
        heads = []
        for h in range(H):
            q_h = q[:, h * hd:(h + 1) * hd] * scale
            k_h = k[:, h * hd:(h + 1) * hd]
            v_h = v[:, h * hd:(h + 1) * hd]
            s = jax.lax.dot_general(q_h, k_h, (((1,), (1,)), ((), ())),
                                    preferred_element_type=jnp.float32)   # (T, S)
            logits_ref[0, h] = s                               # pre-softmax logits
            p = _softmax_rows(s)
            heads.append(jnp.dot(p, v_h, preferred_element_type=jnp.float32))
        attn = jnp.concatenate(heads, axis=-1)                 # (T, C)
        y = jnp.dot(attn, wo_ref[...], preferred_element_type=jnp.float32)
        o_ref[0] = (x + y).astype(o_ref.dtype)
    return kernel


def _make_ffn_block_kernel(K, scale):
    """LN3 + causal left-pad + im2col conv (single MXU matmul) + GELU + linear + residual."""
    def kernel(x_ref, g_ref, b_ref, wconv_ref, bconv_ref, w2_ref, b2_ref, o_ref):
        x = x_ref[0].astype(jnp.float32)                       # (T, C)
        T, C = x.shape
        xn = _layer_norm(x, g_ref[...], b_ref[...])
        # causal LEFT padding in-kernel (== nn.ConstantPad1d((K-1, 0), 0) + Conv1d)
        xp = jnp.concatenate([jnp.zeros((K - 1, C), jnp.float32), xn], axis=0)  # (T+K-1, C)
        # im2col: cols[t, j*C + c] = xp[t + j, c]  -> single matmul, contraction K*C
        cols = jnp.concatenate([xp[j:j + T, :] for j in range(K)], axis=1)       # (T, K*C)
        h = jnp.dot(cols, wconv_ref[...], preferred_element_type=jnp.float32)    # (T, 4C)
        h = (h + bconv_ref[...]) * scale
        h = 0.5 * h * (1.0 + _erf(h * 0.7071067811865476))     # exact (erf) GELU
        y = jnp.dot(h, w2_ref[...], preferred_element_type=jnp.float32) + b2_ref[...]
        o_ref[0] = (x + y).astype(o_ref.dtype)
    return kernel


# ----------------------------- kernel wrappers ------------------------------ #

def _compiler_params():
    return pltpu.CompilerParams(dimension_semantics=("parallel",),
                                vmem_limit_bytes=_VMEM_LIMIT)


def self_attn_block(x_btc, ln_g, ln_b, w_qkv, w_out, num_heads):
    B, T, C = x_btc.shape
    scale = (C // num_heads) ** (-0.5)
    return pl.pallas_call(
        _make_self_attn_block_kernel(num_heads, scale),
        out_shape=jax.ShapeDtypeStruct((B, T, C), x_btc.dtype),
        grid=(B,),
        in_specs=[pl.BlockSpec((1, T, C), lambda b: (b, 0, 0)),
                  pl.BlockSpec((1, C), lambda b: (0, 0)),
                  pl.BlockSpec((1, C), lambda b: (0, 0)),
                  pl.BlockSpec((C, 3 * C), lambda b: (0, 0)),
                  pl.BlockSpec((C, C), lambda b: (0, 0))],
        out_specs=pl.BlockSpec((1, T, C), lambda b: (b, 0, 0)),
        compiler_params=_compiler_params(),
    )(x_btc, ln_g.reshape(1, C), ln_b.reshape(1, C), w_qkv, w_out)


def cross_attn_block(x_btc, e_bsc, ln_g, ln_b, w_q, w_k, w_v, w_out, num_heads):
    B, T, C = x_btc.shape
    S = e_bsc.shape[1]
    H = num_heads
    scale = (C // H) ** (-0.5)
    return pl.pallas_call(
        _make_cross_attn_block_kernel(H, scale),
        out_shape=(jax.ShapeDtypeStruct((B, T, C), x_btc.dtype),
                   jax.ShapeDtypeStruct((B, H, T, S), jnp.float32)),
        grid=(B,),
        in_specs=[pl.BlockSpec((1, T, C), lambda b: (b, 0, 0)),
                  pl.BlockSpec((1, S, C), lambda b: (b, 0, 0)),
                  pl.BlockSpec((1, C), lambda b: (0, 0)),
                  pl.BlockSpec((1, C), lambda b: (0, 0)),
                  pl.BlockSpec((C, C), lambda b: (0, 0)),
                  pl.BlockSpec((C, C), lambda b: (0, 0)),
                  pl.BlockSpec((C, C), lambda b: (0, 0)),
                  pl.BlockSpec((C, C), lambda b: (0, 0))],
        out_specs=(pl.BlockSpec((1, T, C), lambda b: (b, 0, 0)),
                   pl.BlockSpec((1, H, T, S), lambda b: (b, 0, 0, 0))),
        compiler_params=_compiler_params(),
    )(x_btc, e_bsc, ln_g.reshape(1, C), ln_b.reshape(1, C), w_q, w_k, w_v, w_out)


def ffn_block(x_btc, ln_g, ln_b, w_conv_2d, b_conv, w2, b2, kernel_size):
    B, T, C = x_btc.shape
    KC, F = w_conv_2d.shape
    scale = kernel_size ** (-0.5)
    return pl.pallas_call(
        _make_ffn_block_kernel(kernel_size, scale),
        out_shape=jax.ShapeDtypeStruct((B, T, C), x_btc.dtype),
        grid=(B,),
        in_specs=[pl.BlockSpec((1, T, C), lambda b: (b, 0, 0)),
                  pl.BlockSpec((1, C), lambda b: (0, 0)),
                  pl.BlockSpec((1, C), lambda b: (0, 0)),
                  pl.BlockSpec((KC, F), lambda b: (0, 0)),
                  pl.BlockSpec((1, F), lambda b: (0, 0)),
                  pl.BlockSpec((F, C), lambda b: (0, 0)),
                  pl.BlockSpec((1, C), lambda b: (0, 0))],
        out_specs=pl.BlockSpec((1, T, C), lambda b: (b, 0, 0)),
        compiler_params=_compiler_params(),
    )(x_btc, ln_g.reshape(1, C), ln_b.reshape(1, C), w_conv_2d,
      b_conv.reshape(1, F), w2, b2.reshape(1, C))


# ----------------------------- DecSALayer forward --------------------------- #

def dec_sa_layer(x, encoder_out, p, *, num_heads, kernel_size):
    """x: (T, B, C), encoder_out: (S, B, C) -> (out (T,B,C), attn_logits (B,H,T,S))."""
    T, B, C = x.shape
    # single layout change to batch-major; all three fused blocks stay in (B, ., C)
    x_btc = jnp.transpose(x, (1, 0, 2))             # (B, T, C)
    e_bsc = jnp.transpose(encoder_out, (1, 0, 2))   # (B, S, C)

    x1 = self_attn_block(x_btc, p["ln1_g"], p["ln1_b"],
                         p["self_in_w_t"], p["self_out_w_t"], num_heads)
    x2, attn_logits = cross_attn_block(x1, e_bsc, p["ln2_g"], p["ln2_b"],
                                       p["enc_wq_t"], p["enc_wk_t"], p["enc_wv_t"],
                                       p["enc_out_w_t"], num_heads)
    x3 = ffn_block(x2, p["ln3_g"], p["ln3_b"], p["conv_w_2d"], p["conv_b"],
                   p["ffn2_w_t"], p["ffn2_b"], kernel_size)

    return jnp.transpose(x3, (1, 0, 2)), attn_logits


# ----------------------------- parameter setup ------------------------------ #

def make_params(key, C, kernel_size):
    ks = jax.random.split(key, 8)

    def xavier(k, shape):  # torch-style weight shape (out, in)
        fan_out, fan_in = shape[0], shape[1]
        lim = math.sqrt(6.0 / (fan_in + fan_out))
        return jax.random.uniform(k, shape, jnp.float32, -lim, lim)

    self_in_w = xavier(ks[0], (3 * C, C))          # in_proj_weight (bias=False)
    self_out_w = xavier(ks[1], (C, C))             # out_proj.weight (bias=False)
    enc_in_w = xavier(ks[2], (3 * C, C))
    enc_out_w = xavier(ks[3], (C, C))
    conv_w = 0.05 * jax.random.normal(ks[4], (4 * C, C, kernel_size), jnp.float32)
    conv_b = 0.05 * jax.random.normal(ks[5], (4 * C,), jnp.float32)
    ffn2_w = xavier(ks[6], (C, 4 * C))
    ffn2_b = jnp.zeros((C,), jnp.float32)          # Linear() helper inits bias to 0

    # Conv1d weight (F, C, K) -> im2col matrix (K*C, F): w2d[j*C + c, f] = w[f, c, j]
    conv_w_2d = jnp.transpose(conv_w, (2, 1, 0)).reshape(kernel_size * C, 4 * C)

    return {
        "ln1_g": jnp.ones((C,), jnp.float32), "ln1_b": jnp.zeros((C,), jnp.float32),
        "ln2_g": jnp.ones((C,), jnp.float32), "ln2_b": jnp.zeros((C,), jnp.float32),
        "ln3_g": jnp.ones((C,), jnp.float32), "ln3_b": jnp.zeros((C,), jnp.float32),
        "self_in_w_t": self_in_w.T,                # (C, 3C)
        "self_out_w_t": self_out_w.T,              # (C, C)
        "enc_wq_t": enc_in_w[:C].T,
        "enc_wk_t": enc_in_w[C:2 * C].T,
        "enc_wv_t": enc_in_w[2 * C:].T,
        "enc_out_w_t": enc_out_w.T,
        "conv_w_2d": conv_w_2d,                    # (K*C, 4C)
        "conv_b": conv_b,
        "ffn2_w_t": ffn2_w.T,                      # (4C, C)
        "ffn2_b": ffn2_b,
    }


# ----------------------------------- main ----------------------------------- #

if __name__ == "__main__":
    T, B, C, H, S, K = 8, 2, 32, 4, 12, 9

    key = jax.random.PRNGKey(0)
    k_p, k_x, k_e = jax.random.split(key, 3)
    params = make_params(k_p, C, K)
    x = jax.random.normal(k_x, (T, B, C), jnp.float32)
    encoder_out = jax.random.normal(k_e, (S, B, C), jnp.float32)

    fwd = jax.jit(partial(dec_sa_layer, num_heads=H, kernel_size=K))
    out, attn_logits = fwd(x, encoder_out, params)
    jax.block_until_ready((out, attn_logits))

    assert out.shape == (T, B, C)
    assert attn_logits.shape == (B, H, T, S)
    assert jnp.all(jnp.isfinite(out)) and jnp.all(jnp.isfinite(attn_logits))
    print("KERNEL_OK")
</pallas_src>

<mosaic_0001>
module attributes {stable_mosaic.version = 11 : i64} {
  func.func @kernel(%arg0: i32, %arg1: memref<1x8x32xf32, #tpu.memory_space<vmem>>, %arg2: memref<1x12x32xf32, #tpu.memory_space<vmem>>, %arg3: memref<1x32xf32, #tpu.memory_space<vmem>>, %arg4: memref<1x32xf32, #tpu.memory_space<vmem>>, %arg5: memref<32x32xf32, #tpu.memory_space<vmem>>, %arg6: memref<32x32xf32, #tpu.memory_space<vmem>>, %arg7: memref<32x32xf32, #tpu.memory_space<vmem>>, %arg8: memref<32x32xf32, #tpu.memory_space<vmem>>, %arg9: memref<1x8x32xf32, #tpu.memory_space<vmem>>, %arg10: memref<1x4x8x12xf32, #tpu.memory_space<vmem>>) attributes {dimension_semantics = [#tpu.dimension_semantics<parallel>], iteration_bounds = array<i64: 2>, scalar_prefetch = 0 : i64, scratch_operands = 0 : i64, tpu.core_type = #tpu.core_type<tc>, window_params = [{transform_indices = @transform_0, window_bounds = array<i64: 1, 8, 32>}, {transform_indices = @transform_1, window_bounds = array<i64: 1, 12, 32>}, {pipeline_mode = #tpu.pipeline_mode<synchronous>, transform_indices = @transform_2, window_bounds = array<i64: 1, 32>}, {pipeline_mode = #tpu.pipeline_mode<synchronous>, transform_indices = @transform_3, window_bounds = array<i64: 1, 32>}, {pipeline_mode = #tpu.pipeline_mode<synchronous>, transform_indices = @transform_4, window_bounds = array<i64: 32, 32>}, {pipeline_mode = #tpu.pipeline_mode<synchronous>, transform_indices = @transform_5, window_bounds = array<i64: 32, 32>}, {pipeline_mode = #tpu.pipeline_mode<synchronous>, transform_indices = @transform_6, window_bounds = array<i64: 32, 32>}, {pipeline_mode = #tpu.pipeline_mode<synchronous>, transform_indices = @transform_7, window_bounds = array<i64: 32, 32>}, {transform_indices = @transform_8, window_bounds = array<i64: 1, 8, 32>}, {transform_indices = @transform_9, window_bounds = array<i64: 1, 4, 8, 12>}]} {
    %c0 = arith.constant 0 : index
    %c0_0 = arith.constant 0 : index
    %c0_1 = arith.constant 0 : index
    %0 = vector.load %arg1[%c0, %c0_0, %c0_1] : memref<1x8x32xf32, #tpu.memory_space<vmem>>, vector<1x8x32xf32>
    %1 = vector.shape_cast %0 : vector<1x8x32xf32> to vector<8x32xf32>
    %c0_2 = arith.constant 0 : index
    %c0_3 = arith.constant 0 : index
    %c0_4 = arith.constant 0 : index
    %2 = vector.load %arg2[%c0_2, %c0_3, %c0_4] : memref<1x12x32xf32, #tpu.memory_space<vmem>>, vector<1x12x32xf32>
    %3 = vector.shape_cast %2 : vector<1x12x32xf32> to vector<12x32xf32>
    %c0_5 = arith.constant 0 : index
    %c0_6 = arith.constant 0 : index
    %4 = vector.load %arg3[%c0_5, %c0_6] : memref<1x32xf32, #tpu.memory_space<vmem>>, vector<1x32xf32>
    %c0_7 = arith.constant 0 : index
    %c0_8 = arith.constant 0 : index
    %5 = vector.load %arg4[%c0_7, %c0_8] : memref<1x32xf32, #tpu.memory_space<vmem>>, vector<1x32xf32>
    %cst = arith.constant dense<0.000000e+00> : vector<8xf32>
    %6 = vector.multi_reduction <add>, %1, %cst [1] : vector<8x32xf32> to vector<8xf32>
    %7 = vector.shape_cast %6 : vector<8xf32> to vector<8x1xf32>
    %cst_9 = arith.constant 3.200000e+01 : f32
    %8 = vector.broadcast %cst_9 : f32 to vector<8x1xf32>
    %9 = arith.divf %7, %8 : vector<8x1xf32>
    %10 = vector.broadcast %9 : vector<8x1xf32> to vector<8x32xf32>
    %11 = arith.subf %1, %10 : vector<8x32xf32>
    %12 = vector.broadcast %9 : vector<8x1xf32> to vector<8x32xf32>
    %13 = arith.subf %1, %12 : vector<8x32xf32>
    %14 = arith.mulf %11, %13 : vector<8x32xf32>
    %cst_10 = arith.constant dense<0.000000e+00> : vector<8xf32>
    %15 = vector.multi_reduction <add>, %14, %cst_10 [1] : vector<8x32xf32> to vector<8xf32>
    %16 = vector.shape_cast %15 : vector<8xf32> to vector<8x1xf32>
    %cst_11 = arith.constant 3.200000e+01 : f32
    %17 = vector.broadcast %cst_11 : f32 to vector<8x1xf32>
    %18 = arith.divf %16, %17 : vector<8x1xf32>
    %19 = vector.broadcast %9 : vector<8x1xf32> to vector<8x32xf32>
    %20 = arith.subf %1, %19 : vector<8x32xf32>
    %cst_12 = arith.constant 9.99999974E-6 : f32
    %21 = vector.broadcast %cst_12 : f32 to vector<8x1xf32>
    %22 = arith.addf %18, %21 : vector<8x1xf32>
    %23 = math.rsqrt %22 : vector<8x1xf32>
    %24 = vector.broadcast %23 : vector<8x1xf32> to vector<8x32xf32>
    %25 = arith.mulf %20, %24 : vector<8x32xf32>
    %26 = vector.broadcast %4 : vector<1x32xf32> to vector<8x32xf32>
    %27 = arith.mulf %25, %26 : vector<8x32xf32>
    %28 = vector.broadcast %5 : vector<1x32xf32> to vector<8x32xf32>
    %29 = arith.addf %27, %28 : vector<8x32xf32>
    %c0_13 = arith.constant 0 : index
    %c0_14 = arith.constant 0 : index
    %30 = vector.load %arg5[%c0_13, %c0_14] : memref<32x32xf32, #tpu.memory_space<vmem>>, vector<32x32xf32>
    %cst_15 = arith.constant dense<0.000000e+00> : vector<8x32xf32>
    %31 = tpu.matmul %29, %30, %cst_15 {dimension_numbers = #tpu.dot_dimension_numbers<[1], [0], [0], [1], [0, 0, 1, 1], [], []>} : vector<8x32xf32>, vector<32x32xf32>, vector<8x32xf32> -> vector<8x32xf32>
    %c0_16 = arith.constant 0 : index
    %c0_17 = arith.constant 0 : index
    %32 = vector.load %arg6[%c0_16, %c0_17] : memref<32x32xf32, #tpu.memory_space<vmem>>, vector<32x32xf32>
    %cst_18 = arith.constant dense<0.000000e+00> : vector<12x32xf32>
    %33 = tpu.matmul %3, %32, %cst_18 {dimension_numbers = #tpu.dot_dimension_numbers<[1], [0], [0], [1], [0, 0, 1, 1], [], []>} : vector<12x32xf32>, vector<32x32xf32>, vector<12x32xf32> -> vector<12x32xf32>
    %c0_19 = arith.constant 0 : index
    %c0_20 = arith.constant 0 : index
    %34 = vector.load %arg7[%c0_19, %c0_20] : memref<32x32xf32, #tpu.memory_space<vmem>>, vector<32x32xf32>
    %cst_21 = arith.constant dense<0.000000e+00> : vector<12x32xf32>
    %35 = tpu.matmul %3, %34, %cst_21 {dimension_numbers = #tpu.dot_dimension_numbers<[1], [0], [0], [1], [0, 0, 1, 1], [], []>} : vector<12x32xf32>, vector<32x32xf32>, vector<12x32xf32> -> vector<12x32xf32>
    %36 = vector.extract_strided_slice %31 {offsets = [0, 0], sizes = [8, 8], strides = [1, 1]} : vector<8x32xf32> to vector<8x8xf32>
    %cst_22 = arith.constant 0.353553385 : f32
    %37 = vector.broadcast %cst_22 : f32 to vector<8x8xf32>
    %38 = arith.mulf %36, %37 : vector<8x8xf32>
    %39 = vector.extract_strided_slice %33 {offsets = [0, 0], sizes = [12, 8], strides = [1, 1]} : vector<12x32xf32> to vector<12x8xf32>
    %40 = vector.extract_strided_slice %35 {offsets = [0, 0], sizes = [12, 8], strides = [1, 1]} : vector<12x32xf32> to vector<12x8xf32>
    %cst_23 = arith.constant dense<0.000000e+00> : vector<8x12xf32>
    %41 = tpu.matmul %38, %39, %cst_23 {dimension_numbers = #tpu.dot_dimension_numbers<[1], [1], [0], [0], [0, 0, 1, 0], [], []>} : vector<8x8xf32>, vector<12x8xf32>, vector<8x12xf32> -> vector<8x12xf32>
    %c0_24 = arith.constant 0 : index
    %c0_25 = arith.constant 0 : index
    %c0_26 = arith.constant 0 : index
    %c0_27 = arith.constant 0 : index
    %42 = vector.load %arg10[%c0_24, %c0_25, %c0_26, %c0_27] : memref<1x4x8x12xf32, #tpu.memory_space<vmem>>, vector<1x1x8x12xf32>
    %43 = vector.shape_cast %42 : vector<1x1x8x12xf32> to vector<8x12xf32>
    %44 = vector.shape_cast %41 : vector<8x12xf32> to vector<1x1x8x12xf32>
    tpu.vector_store %arg10[%c0_24, %c0_25, %c0_26, %c0_27], %44 {strides = array<i32>} : memref<1x4x8x12xf32, #tpu.memory_space<vmem>>, vector<1x1x8x12xf32>,
    %cst_28 = arith.constant dense<0xFF800000> : vector<8xf32>
    %45 = vector.multi_reduction <maximumf>, %41, %cst_28 [1] : vector<8x12xf32> to vector<8xf32>
    %46 = vector.shape_cast %45 : vector<8xf32> to vector<8x1xf32>
    %47 = vector.broadcast %46 : vector<8x1xf32> to vector<8x12xf32>
    %48 = arith.subf %41, %47 : vector<8x12xf32>
    %49 = math.exp %48 : vector<8x12xf32>
    %cst_29 = arith.constant dense<0.000000e+00> : vector<8xf32>
    %50 = vector.multi_reduction <add>, %49, %cst_29 [1] : vector<8x12xf32> to vector<8xf32>
    %51 = vector.shape_cast %50 : vector<8xf32> to vector<8x1xf32>
    %52 = tpu.reciprocal %51 {approx = true} : vector<8x1xf32> -> vector<8x1xf32>
    %53 = vector.broadcast %52 : vector<8x1xf32> to vector<8x12xf32>
    %54 = arith.mulf %49, %53 : vector<8x12xf32>
    %cst_30 = arith.constant dense<0.000000e+00> : vector<8x8xf32>
    %55 = tpu.matmul %54, %40, %cst_30 {dimension_numbers = #tpu.dot_dimension_numbers<[1], [0], [0], [1], [0, 0, 1, 1], [], []>} : vector<8x12xf32>, vector<12x8xf32>, vector<8x8xf32> -> vector<8x8xf32>
    %56 = vector.extract_strided_slice %31 {offsets = [0, 8], sizes = [8, 8], strides = [1, 1]} : vector<8x32xf32> to vector<8x8xf32>
    %cst_31 = arith.constant 0.353553385 : f32
    %57 = vector.broadcast %cst_31 : f32 to vector<8x8xf32>
    %58 = arith.mulf %56, %57 : vector<8x8xf32>
    %59 = vector.extract_strided_slice %33 {offsets = [0, 8], sizes = [12, 8], strides = [1, 1]} : vector<12x32xf32> to vector<12x8xf32>
    %60 = vector.extract_strided_slice %35 {offsets = [0, 8], sizes = [12, 8], strides = [1, 1]} : vector<12x32xf32> to vector<12x8xf32>
    %cst_32 = arith.constant dense<0.000000e+00> : vector<8x12xf32>
    %61 = tpu.matmul %58, %59, %cst_32 {dimension_numbers = #tpu.dot_dimension_numbers<[1], [1], [0], [0], [0, 0, 1, 0], [], []>} : vector<8x8xf32>, vector<12x8xf32>, vector<8x12xf32> -> vector<8x12xf32>
    %c0_33 = arith.constant 0 : index
    %c1 = arith.constant 1 : index
    %c0_34 = arith.constant 0 : index
    %c0_35 = arith.constant 0 : index
    %62 = vector.load %arg10[%c0_33, %c1, %c0_34, %c0_35] : memref<1x4x8x12xf32, #tpu.memory_space<vmem>>, vector<1x1x8x12xf32>
    %63 = vector.shape_cast %62 : vector<1x1x8x12xf32> to vector<8x12xf32>
    %64 = vector.shape_cast %61 : vector<8x12xf32> to vector<1x1x8x12xf32>
    tpu.vector_store %arg10[%c0_33, %c1, %c0_34, %c0_35], %64 {strides = array<i32>} : memref<1x4x8x12xf32, #tpu.memory_space<vmem>>, vector<1x1x8x12xf32>,
    %cst_36 = arith.constant dense<0xFF800000> : vector<8xf32>
    %65 = vector.multi_reduction <maximumf>, %61, %cst_36 [1] : vector<8x12xf32> to vector<8xf32>
    %66 = vector.shape_cast %65 : vector<8xf32> to vector<8x1xf32>
    %67 = vector.broadcast %66 : vector<8x1xf32> to vector<8x12xf32>
    %68 = arith.subf %61, %67 : vector<8x12xf32>
    %69 = math.exp %68 : vector<8x12xf32>
    %cst_37 = arith.constant dense<0.000000e+00> : vector<8xf32>
    %70 = vector.multi_reduction <add>, %69, %cst_37 [1] : vector<8x12xf32> to vector<8xf32>
    %71 = vector.shape_cast %70 : vector<8xf32> to vector<8x1xf32>
    %72 = tpu.reciprocal %71 {approx = true} : vector<8x1xf32> -> vector<8x1xf32>
    %73 = vector.broadcast %72 : vector<8x1xf32> to vector<8x12xf32>
    %74 = arith.mulf %69, %73 : vector<8x12xf32>
    %cst_38 = arith.constant dense<0.000000e+00> : vector<8x8xf32>
    %75 = tpu.matmul %74, %60, %cst_38 {dimension_numbers = #tpu.dot_dimension_numbers<[1], [0], [0], [1], [0, 0, 1, 1], [], []>} : vector<8x12xf32>, vector<12x8xf32>, vector<8x8xf32> -> vector<8x8xf32>
    %76 = vector.extract_strided_slice %31 {offsets = [0, 16], sizes = [8, 8], strides = [1, 1]} : vector<8x32xf32> to vector<8x8xf32>
    %cst_39 = arith.constant 0.353553385 : f32
    %77 = vector.broadcast %cst_39 : f32 to vector<8x8xf32>
    %78 = arith.mulf %76, %77 : vector<8x8xf32>
    %79 = vector.extract_strided_slice %33 {offsets = [0, 16], sizes = [12, 8], strides = [1, 1]} : vector<12x32xf32> to vector<12x8xf32>
    %80 = vector.extract_strided_slice %35 {offsets = [0, 16], sizes = [12, 8], strides = [1, 1]} : vector<12x32xf32> to vector<12x8xf32>
    %cst_40 = arith.constant dense<0.000000e+00> : vector<8x12xf32>
    %81 = tpu.matmul %78, %79, %cst_40 {dimension_numbers = #tpu.dot_dimension_numbers<[1], [1], [0], [0], [0, 0, 1, 0], [], []>} : vector<8x8xf32>, vector<12x8xf32>, vector<8x12xf32> -> vector<8x12xf32>
    %c0_41 = arith.constant 0 : index
    %c2 = arith.constant 2 : index
    %c0_42 = arith.constant 0 : index
    %c0_43 = arith.constant 0 : index
    %82 = vector.load %arg10[%c0_41, %c2, %c0_42, %c0_43] : memref<1x4x8x12xf32, #tpu.memory_space<vmem>>, vector<1x1x8x12xf32>
    %83 = vector.shape_cast %82 : vector<1x1x8x12xf32> to vector<8x12xf32>
    %84 = vector.shape_cast %81 : vector<8x12xf32> to vector<1x1x8x12xf32>
    tpu.vector_store %arg10[%c0_41, %c2, %c0_42, %c0_43], %84 {strides = array<i32>} : memref<1x4x8x12xf32, #tpu.memory_space<vmem>>, vector<1x1x8x12xf32>,
    %cst_44 = arith.constant dense<0xFF800000> : vector<8xf32>
    %85 = vector.multi_reduction <maximumf>, %81, %cst_44 [1] : vector<8x12xf32> to vector<8xf32>
    %86 = vector.shape_cast %85 : vector<8xf32> to vector<8x1xf32>
    %87 = vector.broadcast %86 : vector<8x1xf32> to vector<8x12xf32>
    %88 = arith.subf %81, %87 : vector<8x12xf32>
    %89 = math.exp %88 : vector<8x12xf32>
    %cst_45 = arith.constant dense<0.000000e+00> : vector<8xf32>
    %90 = vector.multi_reduction <add>, %89, %cst_45 [1] : vector<8x12xf32> to vector<8xf32>
    %91 = vector.shape_cast %90 : vector<8xf32> to vector<8x1xf32>
    %92 = tpu.reciprocal %91 {approx = true} : vector<8x1xf32> -> vector<8x1xf32>
    %93 = vector.broadcast %92 : vector<8x1xf32> to vector<8x12xf32>
    %94 = arith.mulf %89, %93 : vector<8x12xf32>
    %cst_46 = arith.constant dense<0.000000e+00> : vector<8x8xf32>
    %95 = tpu.matmul %94, %80, %cst_46 {dimension_numbers = #tpu.dot_dimension_numbers<[1], [0], [0], [1], [0, 0, 1, 1], [], []>} : vector<8x12xf32>, vector<12x8xf32>, vector<8x8xf32> -> vector<8x8xf32>
    %96 = vector.extract_strided_slice %31 {offsets = [0, 24], sizes = [8, 8], strides = [1, 1]} : vector<8x32xf32> to vector<8x8xf32>
    %cst_47 = arith.constant 0.353553385 : f32
    %97 = vector.broadcast %cst_47 : f32 to vector<8x8xf32>
    %98 = arith.mulf %96, %97 : vector<8x8xf32>
    %99 = vector.extract_strided_slice %33 {offsets = [0, 24], sizes = [12, 8], strides = [1, 1]} : vector<12x32xf32> to vector<12x8xf32>
    %100 = vector.extract_strided_slice %35 {offsets = [0, 24], sizes = [12, 8], strides = [1, 1]} : vector<12x32xf32> to vector<12x8xf32>
    %cst_48 = arith.constant dense<0.000000e+00> : vector<8x12xf32>
    %101 = tpu.matmul %98, %99, %cst_48 {dimension_numbers = #tpu.dot_dimension_numbers<[1], [1], [0], [0], [0, 0, 1, 0], [], []>} : vector<8x8xf32>, vector<12x8xf32>, vector<8x12xf32> -> vector<8x12xf32>
    %c0_49 = arith.constant 0 : index
    %c3 = arith.constant 3 : index
    %c0_50 = arith.constant 0 : index
    %c0_51 = arith.constant 0 : index
    %102 = vector.load %arg10[%c0_49, %c3, %c0_50, %c0_51] : memref<1x4x8x12xf32, #tpu.memory_space<vmem>>, vector<1x1x8x12xf32>
    %103 = vector.shape_cast %102 : vector<1x1x8x12xf32> to vector<8x12xf32>
    %104 = vector.shape_cast %101 : vector<8x12xf32> to vector<1x1x8x12xf32>
    tpu.vector_store %arg10[%c0_49, %c3, %c0_50, %c0_51], %104 {strides = array<i32>} : memref<1x4x8x12xf32, #tpu.memory_space<vmem>>, vector<1x1x8x12xf32>,
    %cst_52 = arith.constant dense<0xFF800000> : vector<8xf32>
    %105 = vector.multi_reduction <maximumf>, %101, %cst_52 [1] : vector<8x12xf32> to vector<8xf32>
    %106 = vector.shape_cast %105 : vector<8xf32> to vector<8x1xf32>
    %107 = vector.broadcast %106 : vector<8x1xf32> to vector<8x12xf32>
    %108 = arith.subf %101, %107 : vector<8x12xf32>
    %109 = math.exp %108 : vector<8x12xf32>
    %cst_53 = arith.constant dense<0.000000e+00> : vector<8xf32>
    %110 = vector.multi_reduction <add>, %109, %cst_53 [1] : vector<8x12xf32> to vector<8xf32>
    %111 = vector.shape_cast %110 : vector<8xf32> to vector<8x1xf32>
    %112 = tpu.reciprocal %111 {approx = true} : vector<8x1xf32> -> vector<8x1xf32>
    %113 = vector.broadcast %112 : vector<8x1xf32> to vector<8x12xf32>
    %114 = arith.mulf %109, %113 : vector<8x12xf32>
    %cst_54 = arith.constant dense<0.000000e+00> : vector<8x8xf32>
    %115 = tpu.matmul %114, %100, %cst_54 {dimension_numbers = #tpu.dot_dimension_numbers<[1], [0], [0], [1], [0, 0, 1, 1], [], []>} : vector<8x12xf32>, vector<12x8xf32>, vector<8x8xf32> -> vector<8x8xf32>
    %116 = tpu.concatenate %55, %75, %95, %115 in 1 : vector<8x8xf32>, vector<8x8xf32>, vector<8x8xf32>, vector<8x8xf32> -> vector<8x32xf32>
    %c0_55 = arith.constant 0 : index
    %c0_56 = arith.constant 0 : index
    %117 = vector.load %arg8[%c0_55, %c0_56] : memref<32x32xf32, #tpu.memory_space<vmem>>, vector<32x32xf32>
    %cst_57 = arith.constant dense<0.000000e+00> : vector<8x32xf32>
    %118 = tpu.matmul %116, %117, %cst_57 {dimension_numbers = #tpu.dot_dimension_numbers<[1], [0], [0], [1], [0, 0, 1, 1], [], []>} : vector<8x32xf32>, vector<32x32xf32>, vector<8x32xf32> -> vector<8x32xf32>
    %119 = arith.addf %1, %118 : vector<8x32xf32>
    %c0_58 = arith.constant 0 : index
    %c0_59 = arith.constant 0 : index
    %c0_60 = arith.constant 0 : index
    %120 = vector.load %arg9[%c0_58, %c0_59, %c0_60] : memref<1x8x32xf32, #tpu.memory_space<vmem>>, vector<1x8x32xf32>
    %121 = vector.shape_cast %120 : vector<1x8x32xf32> to vector<8x32xf32>
    %122 = vector.shape_cast %119 : vector<8x32xf32> to vector<1x8x32xf32>
    tpu.vector_store %arg9[%c0_58, %c0_59, %c0_60], %122 {strides = array<i32>} : memref<1x8x32xf32, #tpu.memory_space<vmem>>, vector<1x8x32xf32>,
    return
  }
  func.func @transform_0(%arg0: i32) -> (i32, i32, i32) {
    %c0_i32 = arith.constant 0 : i32
    %c0_i32_0 = arith.constant 0 : i32
    %c0_i32_1 = arith.constant 0 : i32
    return %arg0, %c0_i32, %c0_i32_0 : i32, i32, i32
  }
  func.func @transform_1(%arg0: i32) -> (i32, i32, i32) {
    %c0_i32 = arith.constant 0 : i32
    %c0_i32_0 = arith.constant 0 : i32
    %c0_i32_1 = arith.constant 0 : i32
    return %arg0, %c0_i32, %c0_i32_0 : i32, i32, i32
  }
  func.func @transform_2(%arg0: i32) -> (i32, i32) {
    %c0_i32 = arith.constant 0 : i32
    %c0_i32_0 = arith.constant 0 : i32
    %c0_i32_1 = arith.constant 0 : i32
    return %c0_i32, %c0_i32_0 : i32, i32
  }
  func.func @transform_3(%arg0: i32) -> (i32, i32) {
    %c0_i32 = arith.constant 0 : i32
    %c0_i32_0 = arith.constant 0 : i32
    %c0_i32_1 = arith.constant 0 : i32
    return %c0_i32, %c0_i32_0 : i32, i32
  }
  func.func @transform_4(%arg0: i32) -> (i32, i32) {
    %c0_i32 = arith.constant 0 : i32
    %c0_i32_0 = arith.constant 0 : i32
    %c0_i32_1 = arith.constant 0 : i32
    return %c0_i32, %c0_i32_0 : i32, i32
  }
  func.func @transform_5(%arg0: i32) -> (i32, i32) {
    %c0_i32 = arith.constant 0 : i32
    %c0_i32_0 = arith.constant 0 : i32
    %c0_i32_1 = arith.constant 0 : i32
    return %c0_i32, %c0_i32_0 : i32, i32
  }
  func.func @transform_6(%arg0: i32) -> (i32, i32) {
    %c0_i32 = arith.constant 0 : i32
    %c0_i32_0 = arith.constant 0 : i32
    %c0_i32_1 = arith.constant 0 : i32
    return %c0_i32, %c0_i32_0 : i32, i32
  }
  func.func @transform_7(%arg0: i32) -> (i32, i32) {
    %c0_i32 = arith.constant 0 : i32
    %c0_i32_0 = arith.constant 0 : i32
    %c0_i32_1 = arith.constant 0 : i32
    return %c0_i32, %c0_i32_0 : i32, i32
  }
  func.func @transform_8(%arg0: i32) -> (i32, i32, i32) {
    %c0_i32 = arith.constant 0 : i32
    %c0_i32_0 = arith.constant 0 : i32
    %c0_i32_1 = arith.constant 0 : i32
    return %arg0, %c0_i32, %c0_i32_0 : i32, i32, i32
  }
  func.func @transform_9(%arg0: i32) -> (i32, i32, i32, i32) {
    %c0_i32 = arith.constant 0 : i32
    %c0_i32_0 = arith.constant 0 : i32
    %c0_i32_1 = arith.constant 0 : i32
    %c0_i32_2 = arith.constant 0 : i32
    return %arg0, %c0_i32, %c0_i32_0, %c0_i32_1 : i32, i32, i32, i32
  }
}

module attributes {stable_mosaic.version = 11 : i64} {
  func.func @kernel(%arg0: i32, %arg1: memref<1x8x32xf32, #tpu.memory_space<vmem>>, %arg2: memref<1x32xf32, #tpu.memory_space<vmem>>, %arg3: memref<1x32xf32, #tpu.memory_space<vmem>>, %arg4: memref<32x96xf32, #tpu.memory_space<vmem>>, %arg5: memref<32x32xf32, #tpu.memory_space<vmem>>, %arg6: memref<1x8x32xf32, #tpu.memory_space<vmem>>) attributes {dimension_semantics = [#tpu.dimension_semantics<parallel>], iteration_bounds = array<i64: 2>, scalar_prefetch = 0 : i64, scratch_operands = 0 : i64, tpu.core_type = #tpu.core_type<tc>, window_params = [{transform_indices = @transform_0, window_bounds = array<i64: 1, 8, 32>}, {pipeline_mode = #tpu.pipeline_mode<synchronous>, transform_indices = @transform_1, window_bounds = array<i64: 1, 32>}, {pipeline_mode = #tpu.pipeline_mode<synchronous>, transform_indices = @transform_2, window_bounds = array<i64: 1, 32>}, {pipeline_mode = #tpu.pipeline_mode<synchronous>, transform_indices = @transform_3, window_bounds = array<i64: 32, 96>}, {pipeline_mode = #tpu.pipeline_mode<synchronous>, transform_indices = @transform_4, window_bounds = array<i64: 32, 32>}, {transform_indices = @transform_5, window_bounds = array<i64: 1, 8, 32>}]} {
    %c0 = arith.constant 0 : index
    %c0_0 = arith.constant 0 : index
    %c0_1 = arith.constant 0 : index
    %0 = vector.load %arg1[%c0, %c0_0, %c0_1] : memref<1x8x32xf32, #tpu.memory_space<vmem>>, vector<1x8x32xf32>
    %1 = vector.shape_cast %0 : vector<1x8x32xf32> to vector<8x32xf32>
    %c0_2 = arith.constant 0 : index
    %c0_3 = arith.constant 0 : index
    %2 = vector.load %arg2[%c0_2, %c0_3] : memref<1x32xf32, #tpu.memory_space<vmem>>, vector<1x32xf32>
    %c0_4 = arith.constant 0 : index
    %c0_5 = arith.constant 0 : index
    %3 = vector.load %arg3[%c0_4, %c0_5] : memref<1x32xf32, #tpu.memory_space<vmem>>, vector<1x32xf32>
    %cst = arith.constant dense<0.000000e+00> : vector<8xf32>
    %4 = vector.multi_reduction <add>, %1, %cst [1] : vector<8x32xf32> to vector<8xf32>
    %5 = vector.shape_cast %4 : vector<8xf32> to vector<8x1xf32>
    %cst_6 = arith.constant 3.200000e+01 : f32
    %6 = vector.broadcast %cst_6 : f32 to vector<8x1xf32>
    %7 = arith.divf %5, %6 : vector<8x1xf32>
    %8 = vector.broadcast %7 : vector<8x1xf32> to vector<8x32xf32>
    %9 = arith.subf %1, %8 : vector<8x32xf32>
    %10 = vector.broadcast %7 : vector<8x1xf32> to vector<8x32xf32>
    %11 = arith.subf %1, %10 : vector<8x32xf32>
    %12 = arith.mulf %9, %11 : vector<8x32xf32>
    %cst_7 = arith.constant dense<0.000000e+00> : vector<8xf32>
    %13 = vector.multi_reduction <add>, %12, %cst_7 [1] : vector<8x32xf32> to vector<8xf32>
    %14 = vector.shape_cast %13 : vector<8xf32> to vector<8x1xf32>
    %cst_8 = arith.constant 3.200000e+01 : f32
    %15 = vector.broadcast %cst_8 : f32 to vector<8x1xf32>
    %16 = arith.divf %14, %15 : vector<8x1xf32>
    %17 = vector.broadcast %7 : vector<8x1xf32> to vector<8x32xf32>
    %18 = arith.subf %1, %17 : vector<8x32xf32>
    %cst_9 = arith.constant 9.99999974E-6 : f32
    %19 = vector.broadcast %cst_9 : f32 to vector<8x1xf32>
    %20 = arith.addf %16, %19 : vector<8x1xf32>
    %21 = math.rsqrt %20 : vector<8x1xf32>
    %22 = vector.broadcast %21 : vector<8x1xf32> to vector<8x32xf32>
    %23 = arith.mulf %18, %22 : vector<8x32xf32>
    %24 = vector.broadcast %2 : vector<1x32xf32> to vector<8x32xf32>
    %25 = arith.mulf %23, %24 : vector<8x32xf32>
    %26 = vector.broadcast %3 : vector<1x32xf32> to vector<8x32xf32>
    %27 = arith.addf %25, %26 : vector<8x32xf32>
    %c0_10 = arith.constant 0 : index
    %c0_11 = arith.constant 0 : index
    %28 = vector.load %arg4[%c0_10, %c0_11] : memref<32x96xf32, #tpu.memory_space<vmem>>, vector<32x96xf32>
    %cst_12 = arith.constant dense<0.000000e+00> : vector<8x96xf32>
    %29 = tpu.matmul %27, %28, %cst_12 {dimension_numbers = #tpu.dot_dimension_numbers<[1], [0], [0], [1], [0, 0, 1, 1], [], []>} : vector<8x32xf32>, vector<32x96xf32>, vector<8x96xf32> -> vector<8x96xf32>
    %30 = vector.extract_strided_slice %29 {offsets = [0, 0], sizes = [8, 8], strides = [1, 1]} : vector<8x96xf32> to vector<8x8xf32>
    %cst_13 = arith.constant 0.353553385 : f32
    %31 = vector.broadcast %cst_13 : f32 to vector<8x8xf32>
    %32 = arith.mulf %30, %31 : vector<8x8xf32>
    %33 = vector.extract_strided_slice %29 {offsets = [0, 32], sizes = [8, 8], strides = [1, 1]} : vector<8x96xf32> to vector<8x8xf32>
    %34 = vector.extract_strided_slice %29 {offsets = [0, 64], sizes = [8, 8], strides = [1, 1]} : vector<8x96xf32> to vector<8x8xf32>
    %cst_14 = arith.constant dense<0.000000e+00> : vector<8x8xf32>
    %35 = tpu.matmul %32, %33, %cst_14 {dimension_numbers = #tpu.dot_dimension_numbers<[1], [1], [0], [0], [0, 0, 1, 0], [], []>} : vector<8x8xf32>, vector<8x8xf32>, vector<8x8xf32> -> vector<8x8xf32>
    %cst_15 = arith.constant dense<0xFF800000> : vector<8xf32>
    %36 = vector.multi_reduction <maximumf>, %35, %cst_15 [1] : vector<8x8xf32> to vector<8xf32>
    %37 = vector.shape_cast %36 : vector<8xf32> to vector<8x1xf32>
    %38 = vector.broadcast %37 : vector<8x1xf32> to vector<8x8xf32>
    %39 = arith.subf %35, %38 : vector<8x8xf32>
    %40 = math.exp %39 : vector<8x8xf32>
    %cst_16 = arith.constant dense<0.000000e+00> : vector<8xf32>
    %41 = vector.multi_reduction <add>, %40, %cst_16 [1] : vector<8x8xf32> to vector<8xf32>
    %42 = vector.shape_cast %41 : vector<8xf32> to vector<8x1xf32>
    %43 = tpu.reciprocal %42 {approx = true} : vector<8x1xf32> -> vector<8x1xf32>
    %44 = vector.broadcast %43 : vector<8x1xf32> to vector<8x8xf32>
    %45 = arith.mulf %40, %44 : vector<8x8xf32>
    %cst_17 = arith.constant dense<0.000000e+00> : vector<8x8xf32>
    %46 = tpu.matmul %45, %34, %cst_17 {dimension_numbers = #tpu.dot_dimension_numbers<[1], [0], [0], [1], [0, 0, 1, 1], [], []>} : vector<8x8xf32>, vector<8x8xf32>, vector<8x8xf32> -> vector<8x8xf32>
    %47 = vector.extract_strided_slice %29 {offsets = [0, 8], sizes = [8, 8], strides = [1, 1]} : vector<8x96xf32> to vector<8x8xf32>
    %cst_18 = arith.constant 0.353553385 : f32
    %48 = vector.broadcast %cst_18 : f32 to vector<8x8xf32>
    %49 = arith.mulf %47, %48 : vector<8x8xf32>
    %50 = vector.extract_strided_slice %29 {offsets = [0, 40], sizes = [8, 8], strides = [1, 1]} : vector<8x96xf32> to vector<8x8xf32>
    %51 = vector.extract_strided_slice %29 {offsets = [0, 72], sizes = [8, 8], strides = [1, 1]} : vector<8x96xf32> to vector<8x8xf32>
    %cst_19 = arith.constant dense<0.000000e+00> : vector<8x8xf32>
    %52 = tpu.matmul %49, %50, %cst_19 {dimension_numbers = #tpu.dot_dimension_numbers<[1], [1], [0], [0], [0, 0, 1, 0], [], []>} : vector<8x8xf32>, vector<8x8xf32>, vector<8x8xf32> -> vector<8x8xf32>
    %cst_20 = arith.constant dense<0xFF800000> : vector<8xf32>
    %53 = vector.multi_reduction <maximumf>, %52, %cst_20 [1] : vector<8x8xf32> to vector<8xf32>
    %54 = vector.shape_cast %53 : vector<8xf32> to vector<8x1xf32>
    %55 = vector.broadcast %54 : vector<8x1xf32> to vector<8x8xf32>
    %56 = arith.subf %52, %55 : vector<8x8xf32>
    %57 = math.exp %56 : vector<8x8xf32>
    %cst_21 = arith.constant dense<0.000000e+00> : vector<8xf32>
    %58 = vector.multi_reduction <add>, %57, %cst_21 [1] : vector<8x8xf32> to vector<8xf32>
    %59 = vector.shape_cast %58 : vector<8xf32> to vector<8x1xf32>
    %60 = tpu.reciprocal %59 {approx = true} : vector<8x1xf32> -> vector<8x1xf32>
    %61 = vector.broadcast %60 : vector<8x1xf32> to vector<8x8xf32>
    %62 = arith.mulf %57, %61 : vector<8x8xf32>
    %cst_22 = arith.constant dense<0.000000e+00> : vector<8x8xf32>
    %63 = tpu.matmul %62, %51, %cst_22 {dimension_numbers = #tpu.dot_dimension_numbers<[1], [0], [0], [1], [0, 0, 1, 1], [], []>} : vector<8x8xf32>, vector<8x8xf32>, vector<8x8xf32> -> vector<8x8xf32>
    %64 = vector.extract_strided_slice %29 {offsets = [0, 16], sizes = [8, 8], strides = [1, 1]} : vector<8x96xf32> to vector<8x8xf32>
    %cst_23 = arith.constant 0.353553385 : f32
    %65 = vector.broadcast %cst_23 : f32 to vector<8x8xf32>
    %66 = arith.mulf %64, %65 : vector<8x8xf32>
    %67 = vector.extract_strided_slice %29 {offsets = [0, 48], sizes = [8, 8], strides = [1, 1]} : vector<8x96xf32> to vector<8x8xf32>
    %68 = vector.extract_strided_slice %29 {offsets = [0, 80], sizes = [8, 8], strides = [1, 1]} : vector<8x96xf32> to vector<8x8xf32>
    %cst_24 = arith.constant dense<0.000000e+00> : vector<8x8xf32>
    %69 = tpu.matmul %66, %67, %cst_24 {dimension_numbers = #tpu.dot_dimension_numbers<[1], [1], [0], [0], [0, 0, 1, 0], [], []>} : vector<8x8xf32>, vector<8x8xf32>, vector<8x8xf32> -> vector<8x8xf32>
    %cst_25 = arith.constant dense<0xFF800000> : vector<8xf32>
    %70 = vector.multi_reduction <maximumf>, %69, %cst_25 [1] : vector<8x8xf32> to vector<8xf32>
    %71 = vector.shape_cast %70 : vector<8xf32> to vector<8x1xf32>
    %72 = vector.broadcast %71 : vector<8x1xf32> to vector<8x8xf32>
    %73 = arith.subf %69, %72 : vector<8x8xf32>
    %74 = math.exp %73 : vector<8x8xf32>
    %cst_26 = arith.constant dense<0.000000e+00> : vector<8xf32>
    %75 = vector.multi_reduction <add>, %74, %cst_26 [1] : vector<8x8xf32> to vector<8xf32>
    %76 = vector.shape_cast %75 : vector<8xf32> to vector<8x1xf32>
    %77 = tpu.reciprocal %76 {approx = true} : vector<8x1xf32> -> vector<8x1xf32>
    %78 = vector.broadcast %77 : vector<8x1xf32> to vector<8x8xf32>
    %79 = arith.mulf %74, %78 : vector<8x8xf32>
    %cst_27 = arith.constant dense<0.000000e+00> : vector<8x8xf32>
    %80 = tpu.matmul %79, %68, %cst_27 {dimension_numbers = #tpu.dot_dimension_numbers<[1], [0], [0], [1], [0, 0, 1, 1], [], []>} : vector<8x8xf32>, vector<8x8xf32>, vector<8x8xf32> -> vector<8x8xf32>
    %81 = vector.extract_strided_slice %29 {offsets = [0, 24], sizes = [8, 8], strides = [1, 1]} : vector<8x96xf32> to vector<8x8xf32>
    %cst_28 = arith.constant 0.353553385 : f32
    %82 = vector.broadcast %cst_28 : f32 to vector<8x8xf32>
    %83 = arith.mulf %81, %82 : vector<8x8xf32>
    %84 = vector.extract_strided_slice %29 {offsets = [0, 56], sizes = [8, 8], strides = [1, 1]} : vector<8x96xf32> to vector<8x8xf32>
    %85 = vector.extract_strided_slice %29 {offsets = [0, 88], sizes = [8, 8], strides = [1, 1]} : vector<8x96xf32> to vector<8x8xf32>
    %cst_29 = arith.constant dense<0.000000e+00> : vector<8x8xf32>
    %86 = tpu.matmul %83, %84, %cst_29 {dimension_numbers = #tpu.dot_dimension_numbers<[1], [1], [0], [0], [0, 0, 1, 0], [], []>} : vector<8x8xf32>, vector<8x8xf32>, vector<8x8xf32> -> vector<8x8xf32>
    %cst_30 = arith.constant dense<0xFF800000> : vector<8xf32>
    %87 = vector.multi_reduction <maximumf>, %86, %cst_30 [1] : vector<8x8xf32> to vector<8xf32>
    %88 = vector.shape_cast %87 : vector<8xf32> to vector<8x1xf32>
    %89 = vector.broadcast %88 : vector<8x1xf32> to vector<8x8xf32>
    %90 = arith.subf %86, %89 : vector<8x8xf32>
    %91 = math.exp %90 : vector<8x8xf32>
    %cst_31 = arith.constant dense<0.000000e+00> : vector<8xf32>
    %92 = vector.multi_reduction <add>, %91, %cst_31 [1] : vector<8x8xf32> to vector<8xf32>
    %93 = vector.shape_cast %92 : vector<8xf32> to vector<8x1xf32>
    %94 = tpu.reciprocal %93 {approx = true} : vector<8x1xf32> -> vector<8x1xf32>
    %95 = vector.broadcast %94 : vector<8x1xf32> to vector<8x8xf32>
    %96 = arith.mulf %91, %95 : vector<8x8xf32>
    %cst_32 = arith.constant dense<0.000000e+00> : vector<8x8xf32>
    %97 = tpu.matmul %96, %85, %cst_32 {dimension_numbers = #tpu.dot_dimension_numbers<[1], [0], [0], [1], [0, 0, 1, 1], [], []>} : vector<8x8xf32>, vector<8x8xf32>, vector<8x8xf32> -> vector<8x8xf32>
    %98 = tpu.concatenate %46, %63, %80, %97 in 1 : vector<8x8xf32>, vector<8x8xf32>, vector<8x8xf32>, vector<8x8xf32> -> vector<8x32xf32>
    %c0_33 = arith.constant 0 : index
    %c0_34 = arith.constant 0 : index
    %99 = vector.load %arg5[%c0_33, %c0_34] : memref<32x32xf32, #tpu.memory_space<vmem>>, vector<32x32xf32>
    %cst_35 = arith.constant dense<0.000000e+00> : vector<8x32xf32>
    %100 = tpu.matmul %98, %99, %cst_35 {dimension_numbers = #tpu.dot_dimension_numbers<[1], [0], [0], [1], [0, 0, 1, 1], [], []>} : vector<8x32xf32>, vector<32x32xf32>, vector<8x32xf32> -> vector<8x32xf32>
    %101 = arith.addf %1, %100 : vector<8x32xf32>
    %c0_36 = arith.constant 0 : index
    %c0_37 = arith.constant 0 : index
    %c0_38 = arith.constant 0 : index
    %102 = vector.load %arg6[%c0_36, %c0_37, %c0_38] : memref<1x8x32xf32, #tpu.memory_space<vmem>>, vector<1x8x32xf32>
    %103 = vector.shape_cast %102 : vector<1x8x32xf32> to vector<8x32xf32>
    %104 = vector.shape_cast %101 : vector<8x32xf32> to vector<1x8x32xf32>
    tpu.vector_store %arg6[%c0_36, %c0_37, %c0_38], %104 {strides = array<i32>} : memref<1x8x32xf32, #tpu.memory_space<vmem>>, vector<1x8x32xf32>,
    return
  }
  func.func @transform_0(%arg0: i32) -> (i32, i32, i32) {
    %c0_i32 = arith.constant 0 : i32
    %c0_i32_0 = arith.constant 0 : i32
    %c0_i32_1 = arith.constant 0 : i32
    return %arg0, %c0_i32, %c0_i32_0 : i32, i32, i32
  }
  func.func @transform_1(%arg0: i32) -> (i32, i32) {
    %c0_i32 = arith.constant 0 : i32
    %c0_i32_0 = arith.constant 0 : i32
    %c0_i32_1 = arith.constant 0 : i32
    return %c0_i32, %c0_i32_0 : i32, i32
  }
  func.func @transform_2(%arg0: i32) -> (i32, i32) {
    %c0_i32 = arith.constant 0 : i32
    %c0_i32_0 = arith.constant 0 : i32
    %c0_i32_1 = arith.constant 0 : i32
    return %c0_i32, %c0_i32_0 : i32, i32
  }
  func.func @transform_3(%arg0: i32) -> (i32, i32) {
    %c0_i32 = arith.constant 0 : i32
    %c0_i32_0 = arith.constant 0 : i32
    %c0_i32_1 = arith.constant 0 : i32
    return %c0_i32, %c0_i32_0 : i32, i32
  }
  func.func @transform_4(%arg0: i32) -> (i32, i32) {
    %c0_i32 = arith.constant 0 : i32
    %c0_i32_0 = arith.constant 0 : i32
    %c0_i32_1 = arith.constant 0 : i32
    return %c0_i32, %c0_i32_0 : i32, i32
  }
  func.func @transform_5(%arg0: i32) -> (i32, i32, i32) {
    %c0_i32 = arith.constant 0 : i32
    %c0_i32_0 = arith.constant 0 : i32
    %c0_i32_1 = arith.constant 0 : i32
    return %arg0, %c0_i32, %c0_i32_0 : i32, i32, i32
  }
}

module attributes {stable_mosaic.version = 11 : i64} {
  func.func @kernel(%arg0: i32, %arg1: memref<1x8x32xf32, #tpu.memory_space<vmem>>, %arg2: memref<1x32xf32, #tpu.memory_space<vmem>>, %arg3: memref<1x32xf32, #tpu.memory_space<vmem>>, %arg4: memref<288x128xf32, #tpu.memory_space<vmem>>, %arg5: memref<1x128xf32, #tpu.memory_space<vmem>>, %arg6: memref<128x32xf32, #tpu.memory_space<vmem>>, %arg7: memref<1x32xf32, #tpu.memory_space<vmem>>, %arg8: memref<1x8x32xf32, #tpu.memory_space<vmem>>) attributes {dimension_semantics = [#tpu.dimension_semantics<parallel>], iteration_bounds = array<i64: 2>, scalar_prefetch = 0 : i64, scratch_operands = 0 : i64, tpu.core_type = #tpu.core_type<tc>, window_params = [{transform_indices = @transform_0, window_bounds = array<i64: 1, 8, 32>}, {pipeline_mode = #tpu.pipeline_mode<synchronous>, transform_indices = @transform_1, window_bounds = array<i64: 1, 32>}, {pipeline_mode = #tpu.pipeline_mode<synchronous>, transform_indices = @transform_2, window_bounds = array<i64: 1, 32>}, {pipeline_mode = #tpu.pipeline_mode<synchronous>, transform_indices = @transform_3, window_bounds = array<i64: 288, 128>}, {pipeline_mode = #tpu.pipeline_mode<synchronous>, transform_indices = @transform_4, window_bounds = array<i64: 1, 128>}, {pipeline_mode = #tpu.pipeline_mode<synchronous>, transform_indices = @transform_5, window_bounds = array<i64: 128, 32>}, {pipeline_mode = #tpu.pipeline_mode<synchronous>, transform_indices = @transform_6, window_bounds = array<i64: 1, 32>}, {transform_indices = @transform_7, window_bounds = array<i64: 1, 8, 32>}]} {
    %c0 = arith.constant 0 : index
    %c0_0 = arith.constant 0 : index
    %c0_1 = arith.constant 0 : index
    %0 = vector.load %arg1[%c0, %c0_0, %c0_1] : memref<1x8x32xf32, #tpu.memory_space<vmem>>, vector<1x8x32xf32>
    %1 = vector.shape_cast %0 : vector<1x8x32xf32> to vector<8x32xf32>
    %c0_2 = arith.constant 0 : index
    %c0_3 = arith.constant 0 : index
    %2 = vector.load %arg2[%c0_2, %c0_3] : memref<1x32xf32, #tpu.memory_space<vmem>>, vector<1x32xf32>
    %c0_4 = arith.constant 0 : index
    %c0_5 = arith.constant 0 : index
    %3 = vector.load %arg3[%c0_4, %c0_5] : memref<1x32xf32, #tpu.memory_space<vmem>>, vector<1x32xf32>
    %cst = arith.constant dense<0.000000e+00> : vector<8xf32>
    %4 = vector.multi_reduction <add>, %1, %cst [1] : vector<8x32xf32> to vector<8xf32>
    %5 = vector.shape_cast %4 : vector<8xf32> to vector<8x1xf32>
    %cst_6 = arith.constant 3.200000e+01 : f32
    %6 = vector.broadcast %cst_6 : f32 to vector<8x1xf32>
    %7 = arith.divf %5, %6 : vector<8x1xf32>
    %8 = vector.broadcast %7 : vector<8x1xf32> to vector<8x32xf32>
    %9 = arith.subf %1, %8 : vector<8x32xf32>
    %10 = vector.broadcast %7 : vector<8x1xf32> to vector<8x32xf32>
    %11 = arith.subf %1, %10 : vector<8x32xf32>
    %12 = arith.mulf %9, %11 : vector<8x32xf32>
    %cst_7 = arith.constant dense<0.000000e+00> : vector<8xf32>
    %13 = vector.multi_reduction <add>, %12, %cst_7 [1] : vector<8x32xf32> to vector<8xf32>
    %14 = vector.shape_cast %13 : vector<8xf32> to vector<8x1xf32>
    %cst_8 = arith.constant 3.200000e+01 : f32
    %15 = vector.broadcast %cst_8 : f32 to vector<8x1xf32>
    %16 = arith.divf %14, %15 : vector<8x1xf32>
    %17 = vector.broadcast %7 : vector<8x1xf32> to vector<8x32xf32>
    %18 = arith.subf %1, %17 : vector<8x32xf32>
    %cst_9 = arith.constant 9.99999974E-6 : f32
    %19 = vector.broadcast %cst_9 : f32 to vector<8x1xf32>
    %20 = arith.addf %16, %19 : vector<8x1xf32>
    %21 = math.rsqrt %20 : vector<8x1xf32>
    %22 = vector.broadcast %21 : vector<8x1xf32> to vector<8x32xf32>
    %23 = arith.mulf %18, %22 : vector<8x32xf32>
    %24 = vector.broadcast %2 : vector<1x32xf32> to vector<8x32xf32>
    %25 = arith.mulf %23, %24 : vector<8x32xf32>
    %26 = vector.broadcast %3 : vector<1x32xf32> to vector<8x32xf32>
    %27 = arith.addf %25, %26 : vector<8x32xf32>
    %cst_10 = arith.constant 0.000000e+00 : f32
    %28 = vector.broadcast %cst_10 : f32 to vector<8x32xf32>
    %29 = tpu.concatenate %28, %27 in 0 : vector<8x32xf32>, vector<8x32xf32> -> vector<16x32xf32>
    %30 = vector.extract_strided_slice %29 {offsets = [0, 0], sizes = [8, 32], strides = [1, 1]} : vector<16x32xf32> to vector<8x32xf32>
    %31 = vector.extract_strided_slice %29 {offsets = [1, 0], sizes = [8, 32], strides = [1, 1]} : vector<16x32xf32> to vector<8x32xf32>
    %32 = vector.extract_strided_slice %29 {offsets = [2, 0], sizes = [8, 32], strides = [1, 1]} : vector<16x32xf32> to vector<8x32xf32>
    %33 = vector.extract_strided_slice %29 {offsets = [3, 0], sizes = [8, 32], strides = [1, 1]} : vector<16x32xf32> to vector<8x32xf32>
    %34 = vector.extract_strided_slice %29 {offsets = [4, 0], sizes = [8, 32], strides = [1, 1]} : vector<16x32xf32> to vector<8x32xf32>
    %35 = vector.extract_strided_slice %29 {offsets = [5, 0], sizes = [8, 32], strides = [1, 1]} : vector<16x32xf32> to vector<8x32xf32>
    %36 = vector.extract_strided_slice %29 {offsets = [6, 0], sizes = [8, 32], strides = [1, 1]} : vector<16x32xf32> to vector<8x32xf32>
    %37 = vector.extract_strided_slice %29 {offsets = [7, 0], sizes = [8, 32], strides = [1, 1]} : vector<16x32xf32> to vector<8x32xf32>
    %38 = vector.extract_strided_slice %29 {offsets = [8, 0], sizes = [8, 32], strides = [1, 1]} : vector<16x32xf32> to vector<8x32xf32>
    %39 = tpu.concatenate %30, %31, %32, %33, %34, %35, %36, %37, %38 in 1 : vector<8x32xf32>, vector<8x32xf32>, vector<8x32xf32>, vector<8x32xf32>, vector<8x32xf32>, vector<8x32xf32>, vector<8x32xf32>, vector<8x32xf32>, vector<8x32xf32> -> vector<8x288xf32>
    %c0_11 = arith.constant 0 : index
    %c0_12 = arith.constant 0 : index
    %40 = vector.load %arg4[%c0_11, %c0_12] : memref<288x128xf32, #tpu.memory_space<vmem>>, vector<288x128xf32>
    %cst_13 = arith.constant dense<0.000000e+00> : vector<8x128xf32>
    %41 = tpu.matmul %39, %40, %cst_13 {dimension_numbers = #tpu.dot_dimension_numbers<[1], [0], [0], [1], [0, 0, 1, 1], [], []>} : vector<8x288xf32>, vector<288x128xf32>, vector<8x128xf32> -> vector<8x128xf32>
    %c0_14 = arith.constant 0 : index
    %c0_15 = arith.constant 0 : index
    %42 = vector.load %arg5[%c0_14, %c0_15] : memref<1x128xf32, #tpu.memory_space<vmem>>, vector<1x128xf32>
    %43 = vector.broadcast %42 : vector<1x128xf32> to vector<8x128xf32>
    %44 = arith.addf %41, %43 : vector<8x128xf32>
    %cst_16 = arith.constant 0.333333343 : f32
    %45 = vector.broadcast %cst_16 : f32 to vector<8x128xf32>
    %46 = arith.mulf %44, %45 : vector<8x128xf32>
    %cst_17 = arith.constant 5.000000e-01 : f32
    %47 = vector.broadcast %cst_17 : f32 to vector<8x128xf32>
    %48 = arith.mulf %47, %46 : vector<8x128xf32>
    %cst_18 = arith.constant 0.707106769 : f32
    %49 = vector.broadcast %cst_18 : f32 to vector<8x128xf32>
    %50 = arith.mulf %46, %49 : vector<8x128xf32>
    %51 = math.absf %50 : vector<8x128xf32>
    %cst_19 = arith.constant 0.327591091 : f32
    %52 = vector.broadcast %cst_19 : f32 to vector<8x128xf32>
    %53 = arith.mulf %52, %51 : vector<8x128xf32>
    %cst_20 = arith.constant 1.000000e+00 : f32
    %54 = vector.broadcast %cst_20 : f32 to vector<8x128xf32>
    %55 = arith.addf %54, %53 : vector<8x128xf32>
    %cst_21 = arith.constant 1.000000e+00 : f32
    %56 = vector.broadcast %cst_21 : f32 to vector<8x128xf32>
    %57 = arith.divf %56, %55 : vector<8x128xf32>
    %cst_22 = arith.constant 1.06140542 : f32
    %58 = vector.broadcast %cst_22 : f32 to vector<8x128xf32>
    %59 = arith.mulf %58, %57 : vector<8x128xf32>
    %cst_23 = arith.constant 1.45315206 : f32
    %60 = vector.broadcast %cst_23 : f32 to vector<8x128xf32>
    %61 = arith.subf %59, %60 : vector<8x128xf32>
    %62 = arith.mulf %61, %57 : vector<8x128xf32>
    %cst_24 = arith.constant 1.42141378 : f32
    %63 = vector.broadcast %cst_24 : f32 to vector<8x128xf32>
    %64 = arith.addf %62, %63 : vector<8x128xf32>
    %65 = arith.mulf %64, %57 : vector<8x128xf32>
    %cst_25 = arith.constant 0.284496725 : f32
    %66 = vector.broadcast %cst_25 : f32 to vector<8x128xf32>
    %67 = arith.subf %65, %66 : vector<8x128xf32>
    %68 = arith.mulf %67, %57 : vector<8x128xf32>
    %cst_26 = arith.constant 0.254829586 : f32
    %69 = vector.broadcast %cst_26 : f32 to vector<8x128xf32>
    %70 = arith.addf %68, %69 : vector<8x128xf32>
    %71 = arith.mulf %70, %57 : vector<8x128xf32>
    %cst_27 = arith.constant 0.000000e+00 : f32
    %72 = vector.broadcast %cst_27 : f32 to vector<8x128xf32>
    %73 = arith.subf %72, %51 : vector<8x128xf32>
    %74 = arith.mulf %73, %51 : vector<8x128xf32>
    %75 = math.exp %74 : vector<8x128xf32>
    %76 = arith.mulf %71, %75 : vector<8x128xf32>
    %cst_28 = arith.constant 1.000000e+00 : f32
    %77 = vector.broadcast %cst_28 : f32 to vector<8x128xf32>
    %78 = arith.subf %77, %76 : vector<8x128xf32>
    %cst_29 = arith.constant 0.000000e+00 : f32
    %79 = vector.broadcast %cst_29 : f32 to vector<8x128xf32>
    %80 = arith.cmpf olt, %50, %79 : vector<8x128xf32>
    %cst_30 = arith.constant 0.000000e+00 : f32
    %81 = vector.broadcast %cst_30 : f32 to vector<8x128xf32>
    %82 = arith.subf %81, %78 : vector<8x128xf32>
    %83 = arith.select %80, %82, %78 : vector<8x128xi1>, vector<8x128xf32>
    %cst_31 = arith.constant 1.000000e+00 : f32
    %84 = vector.broadcast %cst_31 : f32 to vector<8x128xf32>
    %85 = arith.addf %84, %83 : vector<8x128xf32>
    %86 = arith.mulf %48, %85 : vector<8x128xf32>
    %c0_32 = arith.constant 0 : index
    %c0_33 = arith.constant 0 : index
    %87 = vector.load %arg6[%c0_32, %c0_33] : memref<128x32xf32, #tpu.memory_space<vmem>>, vector<128x32xf32>
    %cst_34 = arith.constant dense<0.000000e+00> : vector<8x32xf32>
    %88 = tpu.matmul %86, %87, %cst_34 {dimension_numbers = #tpu.dot_dimension_numbers<[1], [0], [0], [1], [0, 0, 1, 1], [], []>} : vector<8x128xf32>, vector<128x32xf32>, vector<8x32xf32> -> vector<8x32xf32>
    %c0_35 = arith.constant 0 : index
    %c0_36 = arith.constant 0 : index
    %89 = vector.load %arg7[%c0_35, %c0_36] : memref<1x32xf32, #tpu.memory_space<vmem>>, vector<1x32xf32>
    %90 = vector.broadcast %89 : vector<1x32xf32> to vector<8x32xf32>
    %91 = arith.addf %88, %90 : vector<8x32xf32>
    %92 = arith.addf %1, %91 : vector<8x32xf32>
    %c0_37 = arith.constant 0 : index
    %c0_38 = arith.constant 0 : index
    %c0_39 = arith.constant 0 : index
    %93 = vector.load %arg8[%c0_37, %c0_38, %c0_39] : memref<1x8x32xf32, #tpu.memory_space<vmem>>, vector<1x8x32xf32>
    %94 = vector.shape_cast %93 : vector<1x8x32xf32> to vector<8x32xf32>
    %95 = vector.shape_cast %92 : vector<8x32xf32> to vector<1x8x32xf32>
    tpu.vector_store %arg8[%c0_37, %c0_38, %c0_39], %95 {strides = array<i32>} : memref<1x8x32xf32, #tpu.memory_space<vmem>>, vector<1x8x32xf32>,
    return
  }
  func.func @transform_0(%arg0: i32) -> (i32, i32, i32) {
    %c0_i32 = arith.constant 0 : i32
    %c0_i32_0 = arith.constant 0 : i32
    %c0_i32_1 = arith.constant 0 : i32
    return %arg0, %c0_i32, %c0_i32_0 : i32, i32, i32
  }
  func.func @transform_1(%arg0: i32) -> (i32, i32) {
    %c0_i32 = arith.constant 0 : i32
    %c0_i32_0 = arith.constant 0 : i32
    %c0_i32_1 = arith.constant 0 : i32
    return %c0_i32, %c0_i32_0 : i32, i32
  }
  func.func @transform_2(%arg0: i32) -> (i32, i32) {
    %c0_i32 = arith.constant 0 : i32
    %c0_i32_0 = arith.constant 0 : i32
    %c0_i32_1 = arith.constant 0 : i32
    return %c0_i32, %c0_i32_0 : i32, i32
  }
  func.func @transform_3(%arg0: i32) -> (i32, i32) {
    %c0_i32 = arith.constant 0 : i32
    %c0_i32_0 = arith.constant 0 : i32
    %c0_i32_1 = arith.constant 0 : i32
    return %c0_i32, %c0_i32_0 : i32, i32
  }
  func.func @transform_4(%arg0: i32) -> (i32, i32) {
    %c0_i32 = arith.constant 0 : i32
    %c0_i32_0 = arith.constant 0 : i32
    %c0_i32_1 = arith.constant 0 : i32
    return %c0_i32, %c0_i32_0 : i32, i32
  }
  func.func @transform_5(%arg0: i32) -> (i32, i32) {
    %c0_i32 = arith.constant 0 : i32
    %c0_i32_0 = arith.constant 0 : i32
    %c0_i32_1 = arith.constant 0 : i32
    return %c0_i32, %c0_i32_0 : i32, i32
  }
  func.func @transform_6(%arg0: i32) -> (i32, i32) {
    %c0_i32 = arith.constant 0 : i32
    %c0_i32_0 = arith.constant 0 : i32
    %c0_i32_1 = arith.constant 0 : i32
    return %c0_i32, %c0_i32_0 : i32, i32
  }
  func.func @transform_7(%arg0: i32) -> (i32, i32, i32) {
    %c0_i32 = arith.constant 0 : i32
    %c0_i32_0 = arith.constant 0 : i32
    %c0_i32_1 = arith.constant 0 : i32
    return %arg0, %c0_i32, %c0_i32_0 : i32, i32, i32
  }
}

</mosaic_0001>

<bundles_post_ra>
// kernel: dec_sa_layer.5
= control target key start
LH: loop header
LB: loop body
LE: loop exit
PB: predicated region body
PF: predicated region fallthrough
CT: control target
= control target key end

     0   :  { %s994_s24 = smov 0   ;;  %s1227_s0 = inlined_call_operand.vmem [shape: f32[2,8,32], index: 0, kind: input, shape index: {}]   ;;  %s1228_s1 = inlined_call_operand.vmem [shape: f32[1,32], index: 1, kind: input, shape index: {}]   ;;  %s1229_s2 = inlined_call_operand.vmem [shape: f32[1,32], index: 2, kind: input, shape index: {}]   ;;  %s1230_s3 = inlined_call_operand.vmem [shape: f32[288,128], index: 3, kind: input, shape index: {}]   ;;  %s1231_s4 = inlined_call_operand.vmem [shape: f32[1,128], index: 4, kind: input, shape index: {}]   ;;  %s1232_s5 = inlined_call_operand.vmem [shape: f32[128,32], index: 5, kind: input, shape index: {}]   ;;  %s1233_s6 = inlined_call_operand.vmem [shape: f32[1,32], index: 6, kind: input, shape index: {}]   ;;  %s1234_s7 = inlined_call_operand.vmem [shape: f32[2,8,32], index: 7, kind: output, shape index: {}]  }
   0x1 LB: > { %s724_s25 = sadd.s32 4294967295, %s946_s24   ;;  %p728_p0 = scmp.ge.s32.totalorder %s946_s24, 1  ;;  %s946_s24 = sphi %s994_s24, %s17_s24  }
   0x2   : > { %p236_p1 = scmp.lt.s32.totalorder %s946_s24, 3 }
   0x4   : > { %p237_p2 = pnand %p728_p0, %p236_p1 }
   0x5   : > { %p266_p3 = scmp.lt.s32.totalorder (!%p237_p2), %s724_s25, 1  ;;  %vm277_vm0 = vcmask (!%p237_p2), 261120   ;;  %v395_v7 = vld [vmem:[%s1230_s3 + $0x100] sm:$0xff] (!%p237_p2)  ;;  %v396_v8 = vld [vmem:[%s1230_s3 + $0x108] sm:$0xff] (!%p237_p2)  ;;  %v948_v10 = vmov (!%p237_p2), 0.0|0.0   ;;  %v397_v11 = vld [vmem:[%s1230_s3 + $0x110] sm:$0xff] (!%p237_p2) }
   0x6   : > { %240 = sbr.rel (%p237_p2) target bundleno = 945 (0x3b1), region = 48  ;;  %v876_v9 = vpack.c.bf16 (!%p237_p2), %v396_v8, %v395_v7  ;;  %875 = vmatprep.subr.bf16.mxu1 (!%p237_p2), %v948_v10  ;;  %v398_v12 = vld [vmem:[%s1230_s3 + $0x118] sm:$0xff] (!%p237_p2)  ;;  %vm949_vm1 = vmmov (!%p237_p2), 0   ;;  %v950_v14 = vmov (!%p237_p2), 0.0   ;;  %v379_v15 = vld [vmem:[%s1230_s3 + $0x80] sm:$0xff] (!%p237_p2)  ;;  %v380_v16 = vld [vmem:[%s1230_s3 + $0x88] sm:$0xff] (!%p237_p2) }
   0x7   : > { %v879_v13 = vpack.c.bf16 (!%p237_p2), %v398_v12, %v397_v11  ;;  %805 = vmatprep.mubr.msk.f32.mxu1 (!%p237_p2), %vm949_vm1, %v950_v14  ;;  %v363_v17 = vld [vmem:[%s1230_s3] sm:$0xff] (!%p237_p2)  ;;  %v843_v18 = vpack.c.bf16 (!%p237_p2), %v380_v16, %v379_v15  ;;  %v364_v19 = vld [vmem:[%s1230_s3 + $0x8] sm:$0xff] (!%p237_p2)  ;;  %v381_v20 = vld [vmem:[%s1230_s3 + $0x90] sm:$0xff] (!%p237_p2)  ;;  %vm322_vm2 = vcmask (!%p237_p2), 1044480   ;;  %v323_v7 = vrot.slane (!%p237_p2), %v950_v14, 3  ;;  %s951_s23 = smov (!%p237_p2), 96  }
   0x8   : > { %877 = vmatpush3.bf16.msra.mxu1 (!%p237_p2), %v876_v9  ;;  %v382_v21 = vld [vmem:[%s1230_s3 + $0x98] sm:$0xff] (!%p237_p2)  ;;  %v845_v22 = vpack.c.bf16 (!%p237_p2), %v364_v19, %v363_v17  ;;  %v365_v24 = vld [vmem:[%s1230_s3 + $0x10] sm:$0xff] (!%p237_p2)  ;;  %v383_v26 = vld [vmem:[%s1230_s3 + $0xa0] sm:$0xff] (!%p237_p2)  ;;  %v349_v8 = vrot.slane (!%p237_p2), %v950_v14, 7  ;;  %vm348_vm3 = vcmask (!%p237_p2), 1040384   ;;  %v309_v12 = vrot.slane (!%p237_p2), %v950_v14, 1 }
   0x9   : > { %878 = vmatprep.subr.bf16.mxu1 (!%p237_p2), %v948_v10  ;;  %v847_v23 = vpack.c.bf16 (!%p237_p2), %v382_v21, %v381_v20  ;;  %v366_v25 = vld [vmem:[%s1230_s3 + $0x18] sm:$0xff] (!%p237_p2)  ;;  %844 = vmatprep.subr.bf16.mxu0 (!%p237_p2), %v843_v18  ;;  %v384_v27 = vld [vmem:[%s1230_s3 + $0xa8] sm:$0xff] (!%p237_p2)  ;;  %v367_v30 = vld [vmem:[%s1230_s3 + $0x20] sm:$0xff] (!%p237_p2)  ;;  %vm308_vm4 = vcmask (!%p237_p2), 1046528   ;;  %vm334_vm5 = vcmask (!%p237_p2), 1042432   ;;  %v316_v15 = vrot.slane (!%p237_p2), %v950_v14, 2 }
   0xa   : > { %846 = vmatpush3.bf16.msra.mxu0 (!%p237_p2), %v845_v22  ;;  %v849_v28 = vpack.c.bf16 (!%p237_p2), %v366_v25, %v365_v24  ;;  %v851_v29 = vpack.c.bf16 (!%p237_p2), %v384_v27, %v383_v26  ;;  %v368_v31 = vld [vmem:[%s1230_s3 + $0x28] sm:$0xff] (!%p237_p2)  ;;  %v385_v32 = vld [vmem:[%s1230_s3 + $0xb0] sm:$0xff] (!%p237_p2)  ;;  %v386_v33 = vld [vmem:[%s1230_s3 + $0xb8] sm:$0xff] (!%p237_p2)  ;;  %v342_v16 = vrot.slane (!%p237_p2), %v950_v14, 6  ;;  %vm315_vm6 = vcmask (!%p237_p2), 1045504   ;;  %s952_s27 = smov (!%p237_p2), 32  }
   0xb   : > { %848 = vmatprep.subr.bf16.mxu0 (!%p237_p2), %v847_v23  ;;  %v853_v34 = vpack.c.bf16 (!%p237_p2), %v368_v31, %v367_v30  ;;  %v855_v35 = vpack.c.bf16 (!%p237_p2), %v386_v33, %v385_v32  ;;  %v369_v36 = vld [vmem:[%s1230_s3 + $0x30] sm:$0xff] (!%p237_p2)  ;;  %v370_v37 = vld [vmem:[%s1230_s3 + $0x38] sm:$0xff] (!%p237_p2)  ;;  %v387_v38 = vld [vmem:[%s1230_s3 + $0xc0] sm:$0xff] (!%p237_p2)  ;;  %vm341_vm7 = vcmask (!%p237_p2), 1041408   ;;  %s953_s28 = smov (!%p237_p2), 64   ;;  %v330_v33 = vrot.slane (!%p237_p2), %v950_v14, 4 }
   0xc   : > { %880 = vmatpush3.bf16.msra.mxu1 (!%p237_p2), %v879_v13  ;;  %v388_v39 = vld [vmem:[%s1230_s3 + $0xc8] sm:$0xff] (!%p237_p2)  ;;  %v857_v40 = vpack.c.bf16 (!%p237_p2), %v370_v37, %v369_v36  ;;  %v371_v42 = vld [vmem:[%s1230_s3 + $0x40] sm:$0xff] (!%p237_p2)  ;;  %v389_v44 = vld [vmem:[%s1230_s3 + $0xd0] sm:$0xff] (!%p237_p2)  ;;  %v335_v13 = vrot.slane (!%p237_p2), %v950_v14, 5  ;;  %vm329_vm8 = vcmask (!%p237_p2), 1043456   ;;  %vm356_vm9 = vcmask (!%p237_p2), 523264  }
   0xd   : > { %s1236_s25 = smov (!%p266_p3, %s724_s25), 1  ;;  %881 = vmatprep.subr.bf16.mxu1 %v948_v10  ;;  %v859_v41 = vpack.c.bf16 %v388_v39, %v387_v38  ;;  %v372_v43 = vld [vmem:[%s1230_s3 + $0x48] sm:$0xff]  ;;  %v390_v45 = vld [vmem:[%s1230_s3 + $0xd8] sm:$0xff]  ;;  %v373_v48 = vld [vmem:[%s1230_s3 + $0x50] sm:$0xff]  ;;  %vm358_vm10 = vcmask 785408  }
   0xe   : > { %s729_s26 = sshll.u32 %s1236_s25, 3  ;;  %850 = vmatpush3.bf16.msra.mxu0 %v849_v28  ;;  %v861_v46 = vpack.c.bf16 %v372_v43, %v371_v42  ;;  %v863_v47 = vpack.c.bf16 %v390_v45, %v389_v44  ;;  %v374_v49 = vld [vmem:[%s1230_s3 + $0x58] sm:$0xff]  ;;  %v391_v54 = vld [vmem:[%s1230_s3 + $0xe0] sm:$0xff]  ;;  %v392_v55 = vld [vmem:[%s1230_s3 + $0xe8] sm:$0xff] }
   0xf   : > { %s269_s29 = scalar_lea.vmem %s1227_s0, %s729_s26  ;;  %852 = vmatprep.subr.bf16.mxu0 %v851_v29  ;;  %v865_v50 = vpack.c.bf16 %v374_v49, %v373_v48  ;;  %v867_v56 = vpack.c.bf16 %v392_v55, %v391_v54  ;;  %v375_v57 = vld [vmem:[%s1230_s3 + $0x60] sm:$0xff]  ;;  %v376_v58 = vld [vmem:[%s1230_s3 + $0x68] sm:$0xff]  ;;  %v579_v55 = vld [vmem:[%s1232_s5 + $0x18] sm:$0xff] }
  0x10   : > { %v1010_v0 = vld [vmem:[%s269_s29] sm:$0xff]  ;;  %v869_v61 = vpack.c.bf16 %v376_v58, %v375_v57  ;;  %v581_v58 = vld [vmem:[%s1232_s5 + $0x28] sm:$0xff] }
  0x11   : > { %v278_v1 = vsel %vm277_vm0, %v1010_v0, 0.0  ;;  %v731_v60 = vld [vmem:[%s1228_s1] ss:$0 sm:$0xff] }
  0x12   : > { %279 = vadd.xlane.f32.xlu0 %v278_v1  ;;  %854 = vmatpush3.bf16.msra.mxu0 %v853_v34  ;;  %v732_v63 = vld [vmem:[%s1229_s2] ss:$0 sm:$0xff]  ;;  %v393_v1 = vld [vmem:[%s1230_s3 + $0xf0] sm:$0xff] }
  0x13   : > { %856 = vmatprep.subr.bf16.mxu0 %v855_v35  ;;  %v580_v57 = vld [vmem:[%s1232_s5 + $0x20] sm:$0xff] }
  0x16   : > { %858 = vmatpush3.bf16.msra.mxu0 %v857_v40 }
  0x17   : > { %860 = vmatprep.subr.bf16.mxu0 %v859_v41 }
  0x1a   : > { %862 = vmatpush3.bf16.msra.mxu0 %v861_v46 }
  0x1b   : > { %864 = vmatprep.subr.bf16.mxu0 %v863_v47 }
  0x1e   : > { %866 = vmatpush3.bf16.msra.mxu0 %v865_v50 }
  0x1f   : > { %868 = vmatprep.subr.bf16.mxu0 %v867_v56 }
  0x22   : > { %870 = vmatpush3.bf16.msra.mxu0 %v869_v61  ;;  %v583_v61 = vld [vmem:[%s1232_s5 + $0x38] sm:$0xff] }
  0x9f   : > { %v280_v2 = vpop.xlane.xlu0 %279 }
  0xa0   : > { %v282_v3 = vmul.f32 0.03125, %v280_v2  ;;  %v394_v2 = vld [vmem:[%s1230_s3 + $0xf8] sm:$0xff] }
  0xa2   : > { %v1015_v4 = vsub.f32 %v1010_v0, %v282_v3 }
  0xa4   : > { %v284_v5 = vmul.f32 %v1015_v4, %v1015_v4 }
  0xa6   : > { %v285_v6 = vsel %vm277_vm0, %v284_v5, 0.0  ;;  %v871_v5 = vpack.c.bf16 %v394_v2, %v393_v1  ;;  %v585_v1 = vld [vmem:[%s1232_s5 + $0x48] sm:$0xff] }
  0xa7   : > { %286 = vadd.xlane.f32.xlu0 %v285_v6  ;;  %v378_v6 = vld [vmem:[%s1230_s3 + $0x78] sm:$0xff] }
  0xa8   : > { %872 = vmatprep.subr.bf16.mxu0 %v871_v5  ;;  %v587_v5 = vld [vmem:[%s1232_s5 + $0x58] sm:$0xff] }
 0x134   : > { %v287_v51 = vpop.xlane.xlu0 %286 }
 0x135   : > { %v288_v52 = vmul.f32 0.03125, %v287_v51  ;;  %v576_v51 = vld [vmem:[%s1232_s5] sm:$0xff] }
 0x137   : > { %v289_v53 = vadd.f32 1e-05, %v288_v52  ;;  %v577_v52 = vld [vmem:[%s1232_s5 + $0x8] sm:$0xff] }
 0x138   : > { %v882_v54 = vpack.c.bf16 %v577_v52, %v576_v51 }
 0x139   : > { %934 = vrsqrt.f32 %v289_v53  ;;  %v578_v53 = vld [vmem:[%s1232_s5 + $0x10] sm:$0xff] }
 0x13a   : > { %v885_v56 = vpack.c.bf16 %v579_v55, %v578_v53 }
 0x143   : > { %v935_v59 = vpop.eup %934 }
 0x144   : > { %v291_v62 = vmul.f32 %v935_v59, %v1015_v4  ;;  %v377_v4 = vld [vmem:[%s1230_s3 + $0x70] sm:$0xff]  ;;  %v888_v59 = vpack.c.bf16 %v581_v58, %v580_v57 }
 0x145   : > { %v873_v9 = vpack.c.bf16 %v378_v6, %v377_v4  ;;  %v588_v6 = vld [vmem:[%s1232_s5 + $0x60] sm:$0xff] }
 0x146   : > { %v298_v3 = vmul.f32 %v731_v60, %v291_v62  ;;  %v582_v60 = vld [vmem:[%s1232_s5 + $0x30] sm:$0xff] }
 0x147   : > { %874 = vmatpush3.bf16.msra.mxu0 %v873_v9  ;;  %v891_v62 = vpack.c.bf16 %v583_v61, %v582_v60  ;;  %v590_v9 = vld [vmem:[%s1232_s5 + $0x70] sm:$0xff] }
 0x148   : > { %v305_v11 = vadd.f32 %v732_v63, %v298_v3  ;;  %v584_v63 = vld [vmem:[%s1232_s5 + $0x40] sm:$0xff]  ;;  %v586_v3 = vld [vmem:[%s1232_s5 + $0x50] sm:$0xff] }
 0x149   : > { %v894_v2 = vpack.c.bf16 %v585_v1, %v584_v63  ;;  %v897_v4 = vpack.c.bf16 %v587_v5, %v586_v3 }
 0x14a   : > { %806 = vmatmul.mubr.msk.f32.vlgmr.msra.gmra.mrb[0].mxu1 %vm277_vm0, %v305_v11  ;;  %v324_v17 = vrot.slane %v305_v11, 3  ;;  %v350_v18 = vrot.slane %v305_v11, 7  ;;  %v310_v19 = vrot.slane %v305_v11, 1  ;;  %v336_v20 = vrot.slane %v305_v11, 5 }
 0x14b   : > { %v317_v21 = vrot.slane %v305_v11, 2  ;;  %v343_v22 = vrot.slane %v305_v11, 6  ;;  %840 = vmatprep.mubr.msk.f32.mxu1 %vm949_vm1, %v950_v14  ;;  %v331_v34 = vrot.slane %v305_v11, 4  ;;  %883 = vmatpush3.bf16.msra.mxu1 %v882_v54  ;;  %v591_v11 = vld [vmem:[%s1232_s5 + $0x78] sm:$0xff] }
 0x14c   : > { %v325_v23 = vsel %vm322_vm2, %v323_v7, %v324_v17  ;;  %v351_v24 = vsel %vm348_vm3, %v349_v8, %v350_v18  ;;  %v311_v25 = vsel %vm308_vm4, %v309_v12, %v310_v19  ;;  %v337_v26 = vsel %vm334_vm5, %v335_v13, %v336_v20  ;;  %884 = vmatprep.subr.bf16.mxu1 %v948_v10  ;;  %v589_v7 = vld [vmem:[%s1232_s5 + $0x68] sm:$0xff] }
 0x14d   : > { %v929_v27 = vpack.i.bf16 %v325_v23, %v351_v24  ;;  %v919_v28 = vpack.i.bf16 %v311_v25, %v337_v26  ;;  %v318_v29 = vsel %vm315_vm6, %v316_v15, %v317_v21  ;;  %v344_v30 = vsel %vm341_vm7, %v342_v16, %v343_v22  ;;  %v733_v15 = vld [vmem:[%s1231_s4] ss:$0 sm:$0xff] }
 0x14e   : > { %v924_v31 = vpack.i.bf16 %v318_v29, %v344_v30  ;;  %v332_v41 = vsel %vm329_vm8, %v330_v33, %v331_v34  ;;  %v900_v8 = vpack.c.bf16 %v589_v7, %v588_v6  ;;  %v903_v12 = vpack.c.bf16 %v591_v11, %v590_v9 }
 0x14f   : > { %930 = vrot.lane.b32.xlu0 %v929_v27, %s951_s23  ;;  %920 = vrot.lane.b32.xlu1 %v919_v28, %s952_s27  ;;  %s273_s27 = scalar_lea.vmem %s1234_s7, %s729_s26 }
 0x150   : > { %886 = vmatpush3.bf16.msra.mxu1 %v885_v56 }
 0x151   : > { %887 = vmatprep.subr.bf16.mxu1 %v948_v10 }
 0x153   : > { %925 = vrot.lane.b32.xlu1 %v924_v31, %s953_s28 }
 0x154   : > { %889 = vmatpush3.bf16.msra.mxu1 %v888_v59 }
 0x155   : > { %890 = vmatprep.subr.bf16.mxu1 %v948_v10 }
 0x158   : > { %892 = vmatpush3.bf16.msra.mxu1 %v891_v62 }
 0x159   : > { %893 = vmatprep.subr.bf16.mxu1 %v948_v10 }
 0x15c   : > { %895 = vmatpush3.bf16.msra.mxu1 %v894_v2 }
 0x15d   : > { %896 = vmatprep.subr.bf16.mxu1 %v948_v10 }
 0x160   : > { %898 = vmatpush3.bf16.msra.mxu1 %v897_v4 }
 0x161   : > { %899 = vmatprep.subr.bf16.mxu1 %v948_v10 }
 0x164   : > { %901 = vmatpush3.bf16.msra.mxu1 %v900_v8 }
 0x165   : > { %902 = vmatprep.subr.bf16.mxu1 %v948_v10 }
 0x168   : > { %904 = vmatpush3.bf16.msra.mxu1 %v903_v12 }
 0x1c1   : > { %v921_v32 = vpop.permute.xlu1 %920  ;;  %v931_v37 = vpop.permute.xlu0 %930 }
 0x1c2   : > { %v923_v35 = vunpack.i.h.bf16 %v921_v32  ;;  %v922_v36 = vunpack.i.l.bf16 %v921_v32  ;;  %v933_v42 = vunpack.i.h.bf16 %v931_v37  ;;  %v932_v43 = vunpack.i.l.bf16 %v931_v37 }
 0x1c4   : > { %v355_v44 = vsel %vm277_vm0, 0.0, %v923_v35  ;;  %v360_v45 = vsel %vm277_vm0, %v332_v41, %v922_v36 }
 0x1c5   : > { %v926_v38 = vpop.permute.xlu1 %925 }
 0x1c6   : > { %v928_v39 = vunpack.i.h.bf16 %v926_v38  ;;  %v927_v40 = vunpack.i.l.bf16 %v926_v38 }
 0x1c8   : > { %v361_v46 = vsel %vm356_vm9, %v360_v45, %v927_v40  ;;  %v357_v47 = vsel %vm356_vm9, %v355_v44, %v928_v39  ;;  %v737_v45 = vld [vmem:[%s1233_s6] ss:$0 sm:$0xff] }
 0x1c9   : > { %v362_v14 = vsel %vm358_vm10, %v361_v46, %v932_v43  ;;  %v359_v48 = vsel %vm358_vm10, %v357_v47, %v933_v42 }
 0x1ca   : > { %472 = vmatprep.mubr.f32.mxu0 %v362_v14 }
 0x1cb   : > { %473 = vmatmul.mubr.f32.vlgmr.msra.gmra.mrb[0].mxu0 %v359_v48 }
 0x21d   : > { %v544_v49 = vpop.f32.mrb[0].mxu1 }
 0x21e   : > { %v807_v50 = vpop.f32.mrb[1].mxu1 }
 0x29e   : > { %v772_v13 = vpop.f32.mrb[0].mxu0 }
 0x29f   : > { %v773_v16 = vpop.f32.mrb[1].mxu0 }
 0x2a0   : > { %v774_v17 = vadd.f32 %v773_v16, %v772_v13 }
 0x2a2   : > { %v475_v18 = vadd.f32 %v774_v17, %v733_v15 }
 0x2a4   : > { %v545_v19 = vadd.f32 %v544_v49, %v475_v18 }
 0x2a6   : > { %v548_v20 = vmul.f32 0.33333334, %v545_v19 }
 0x2a8   : > { %v550_v21 = vmul.f32 0.70710677, %v548_v20  ;;  %v549_v42 = vmul.f32 0.5, %v548_v20 }
 0x2aa   : > { %v551_v22 = vand.u32 2147483647, %v550_v21  ;;  %vm571_vm11 = vcmp.lt.f32.partialorder %v550_v21, 0.0 }
 0x2ac   : > { %v552_v23 = vmul.f32 0.3275911, %v551_v22  ;;  %v565_v25 = vsub.f32 0.0, %v551_v22 }
 0x2ae   : > { %v553_v24 = vadd.f32 1.0, %v552_v23  ;;  %v566_v27 = vmul.f32 %v565_v25, %v551_v22 }
 0x2b0   : > { %936 = vrcp.f32 %v553_v24  ;;  %v567_v29 = vmul.f32 1.442695, %v566_v27 }
 0x2b2   : > { %938 = vpow2.f32 %v567_v29 }
 0x2ba   : > { %v937_v26 = vpop.eup %936 }
 0x2bb   : > { %v556_v10 = vmul.f32 1.0614054, %v937_v26 }
 0x2bc   : > { %v939_v37 = vpop.eup %938 }
 0x2bd   : > { %v735_v28 = vadd.f32 -1.4531521, %v556_v10 }
 0x2bf   : > { %v558_v30 = vmul.f32 %v937_v26, %v735_v28 }
 0x2c1   : > { %v559_v31 = vadd.f32 1.4214138, %v558_v30 }
 0x2c3   : > { %v560_v32 = vmul.f32 %v937_v26, %v559_v31 }
 0x2c5   : > { %v736_v33 = vadd.f32 -0.28449672, %v560_v32 }
 0x2c7   : > { %v562_v34 = vmul.f32 %v937_v26, %v736_v33 }
 0x2c9   : > { %v563_v35 = vadd.f32 0.2548296, %v562_v34 }
 0x2cb   : > { %v564_v36 = vmul.f32 %v937_v26, %v563_v35 }
 0x2cd   : > { %v569_v38 = vmul.f32 %v939_v37, %v564_v36 }
 0x2cf   : > { %v570_v39 = vsub.f32 1.0, %v569_v38 }
 0x2d1   : > { %v572_v40 = vsub.f32 0.0, %v570_v39 }
 0x2d3   : > { %v573_v41 = vsel %vm571_vm11, %v572_v40, %v570_v39 }
 0x2d4   : > { %v574_v43 = vadd.f32 1.0, %v573_v41 }
 0x2d6   : > { %v575_v44 = vmul.f32 %v574_v43, %v549_v42 }
 0x2d8   : > { %841 = vmatmul.mubr.f32.vlgmr.msra.gmra.mrb[2].mxu1 %v575_v44 }
 0x3ab   : > { %v665_v46 = vpop.f32.mrb[2].mxu1 }
 0x3ac   : > { %v666_v47 = vadd.f32 %v737_v45, %v665_v46  ;;  %v842_v14 = vpop.f32.mrb[3].mxu1 }
 0x3ae   : > { %v669_v48 = vadd.f32 %v666_v47, %v1010_v0 }
 0x3b0   : > { %670 = vst.msk [vmem:[%s273_s27] sm:$0xff] %vm277_vm0, %v669_v48 }
 0x3b1 PF: > { %s17_s24 = sadd.s32 1, %s946_s24  }
 0x3b2   : > { %p14_p4 = scmp.ge.s32.totalorder %s17_s24, 4  }
 0x3b4   :  { %16 = sbr.rel (!%p14_p4) target bundleno = 1 (0x1), region = 78 }

// kernel: dec_sa_layer.3
= control target key start
LH: loop header
LB: loop body
LE: loop exit
PB: predicated region body
PF: predicated region fallthrough
CT: control target
= control target key end

     0   :  { %s1363_s18 = smov 0   ;;  %s1494_s0 = inlined_call_operand.vmem [shape: f32[2,8,32], index: 0, kind: input, shape index: {}]   ;;  %s1495_s1 = inlined_call_operand.vmem [shape: f32[1,32], index: 1, kind: input, shape index: {}]   ;;  %s1496_s2 = inlined_call_operand.vmem [shape: f32[1,32], index: 2, kind: input, shape index: {}]   ;;  %s1497_s3 = inlined_call_operand.vmem [shape: f32[32,96], index: 3, kind: input, shape index: {}]   ;;  %s1498_s4 = inlined_call_operand.vmem [shape: f32[32,32], index: 4, kind: input, shape index: {}]   ;;  %s1499_s5 = inlined_call_operand.vmem [shape: f32[2,8,32], index: 5, kind: output, shape index: {}]  }
   0x1 LB: > { %s1140_s19 = sadd.s32 4294967295, %s1314_s18   ;;  %p1144_p0 = scmp.ge.s32.totalorder %s1314_s18, 1  ;;  %s1314_s18 = sphi %s1363_s18, %s15_s18  }
   0x2   : > { %p186_p1 = scmp.lt.s32.totalorder %s1314_s18, 3 }
   0x4   : > { %p187_p2 = pnand %p1144_p0, %p186_p1 }
   0x5   : > { %p212_p3 = scmp.lt.s32.totalorder (!%p187_p2), %s1140_s19, 1  ;;  %vm223_vm0 = vcmask (!%p187_p2), 261120   ;;  %v252_v7 = vld [vmem:[%s1497_s3] sm:$0xff] (!%p187_p2)  ;;  %v253_v8 = vld [vmem:[%s1497_s3 + $0x8] sm:$0xff] (!%p187_p2)  ;;  %v254_v9 = vld [vmem:[%s1497_s3 + $0x10] sm:$0xff] (!%p187_p2)  ;;  %v1316_v10 = vmov (!%p187_p2), 0.0|0.0  }
   0x6   : > { %190 = sbr.rel (%p187_p2) target bundleno = 2267 (0x8db), region = 40  ;;  %1253 = vmatprep.subr.bf16.mxu0 (!%p187_p2), %v1316_v10  ;;  %v1254_v11 = vpack.c.bf16 (!%p187_p2), %v253_v8, %v252_v7  ;;  %v255_v12 = vld [vmem:[%s1497_s3 + $0x18] sm:$0xff] (!%p187_p2)  ;;  %vm1317_vm1 = vmmov (!%p187_p2), 0   ;;  %v1318_v13 = vmov (!%p187_p2), 0.0   ;;  %v1147_v19 = vld [vmem:[%s1495_s1] ss:$0 sm:$0xff] (!%p187_p2) }
   0x7   : > { %1199 = vmatprep.mubr.msk.f32.mxu0 (!%p187_p2), %vm1317_vm1, %v1318_v13  ;;  %1202 = vmatprep.subr.mxu1 (!%p187_p2), %v1318_v13  ;;  %v1257_v14 = vpack.c.bf16 (!%p187_p2), %v255_v12, %v254_v9  ;;  %v1148_v21 = vld [vmem:[%s1496_s2] ss:$0 sm:$0xff] (!%p187_p2)  ;;  %s1319_s11 = smov (!%p187_p2), 64   ;;  %s1320_s12 = smov (!%p187_p2), 96   ;;  %vm333_vm2 = vcmask (!%p187_p2), 64512   ;;  %vm1004_vm3 = vcmask (!%p187_p2), 130048  }
   0x8   : > { %1204 = vmatprep.mubr.msk.f32.mxu1 (!%p187_p2), %vm1317_vm1, %v1318_v13  ;;  %1255 = vmatpush3.bf16.msra.mxu0 (!%p187_p2), %v1254_v11  ;;  %s1321_s13 = smov (!%p187_p2), 88   ;;  %s1322_s14 = smov (!%p187_p2), 120   ;;  %vm1006_vm4 = vcmask (!%p187_p2), 195584  }
   0x9   : > { %1256 = vmatprep.subr.bf16.mxu0 (!%p187_p2), %v1316_v10  ;;  %s1323_s15 = smov (!%p187_p2), 80   ;;  %s1324_s16 = smov (!%p187_p2), 112  }
   0xa   : > { %s1325_s17 = smov (!%p187_p2), 72   ;;  %s1326_s21 = smov (!%p187_p2), 104  }
   0xb   : > { %s1327_s22 = smov (!%p187_p2), 48   ;;  %s1329_s24 = smov (!%p187_p2), 40  }
   0xc   : > { %1258 = vmatpush3.bf16.msra.mxu0 (!%p187_p2), %v1257_v14  ;;  %s1330_s8 = smov (!%p187_p2), 8   ;;  %s1331_s9 = smov (!%p187_p2), 16  }
   0xd   : > { %s1501_s19 = smov (!%p212_p3, %s1140_s19), 1  ;;  %1222 = vmatprep.subr.mxu0 %v1318_v13  ;;  %s1332_s10 = smov 24  }
   0xe   : > { %s1145_s20 = sshll.u32 %s1501_s19, 3 }
   0xf   : > { %s215_s23 = scalar_lea.vmem %s1494_s0, %s1145_s20 }
  0x10   : > { %v1379_v0 = vld [vmem:[%s215_s23] sm:$0xff]  ;;  %s1328_s23 = smov 56  }
  0x11   : > { %v224_v1 = vsel %vm223_vm0, %v1379_v0, 0.0 }
  0x12   : > { %225 = vadd.xlane.f32.xlu0 %v224_v1 }
  0x9f   : > { %v226_v2 = vpop.xlane.xlu0 %225 }
  0xa0   : > { %v228_v3 = vmul.f32 0.03125, %v226_v2 }
  0xa2   : > { %v229_v4 = vsub.f32 %v1379_v0, %v228_v3 }
  0xa4   : > { %v230_v5 = vmul.f32 %v229_v4, %v229_v4 }
  0xa6   : > { %v231_v6 = vsel %vm223_vm0, %v230_v5, 0.0 }
  0xa7   : > { %232 = vadd.xlane.f32.xlu0 %v231_v6 }
 0x134   : > { %v233_v15 = vpop.xlane.xlu0 %232 }
 0x135   : > { %v234_v16 = vmul.f32 0.03125, %v233_v15 }
 0x137   : > { %v235_v17 = vadd.f32 1e-05, %v234_v16 }
 0x139   : > { %1290 = vrsqrt.f32 %v235_v17 }
 0x143   : > { %v1291_v18 = vpop.eup %1290 }
 0x144   : > { %v237_v20 = vmul.f32 %v1291_v18, %v229_v4 }
 0x146   : > { %v244_v22 = vmul.f32 %v1147_v19, %v237_v20 }
 0x148   : > { %v251_v23 = vadd.f32 %v1148_v21, %v244_v22 }
 0x14a   : > { %1200 = vmatmul.mubr.msk.f32.vlgmr.msra.gmra.mrb[0].mxu0 %vm223_vm0, %v251_v23  ;;  %v1008_v23 = vld [vmem:[%s1498_s4] sm:$0xff] }
 0x14b   : > { %1224 = vmatprep.mubr.msk.f32.mxu0 %vm1317_vm1, %v1318_v13 }
 0x21d   : > { %v1414_v24 = vpop.f32.mrb[0].mxu0 }
 0x21e   : > { %420 = vrot.lane.b32.xlu0 %v1414_v24, %s1319_s11  ;;  %331 = vrot.lane.b32.xlu1 %v1414_v24, %s1320_s12  ;;  %v1201_v25 = vpop.f32.mrb[1].mxu0  ;;  %v329_v26 = vmul.f32 0.35355338, %v1414_v24 }
 0x222   : > { %498 = vrot.lane.b32.xlu0 %v1414_v24, %s1321_s13  ;;  %s219_s13 = scalar_lea.vmem %s1499_s5, %s1145_s20 }
 0x226   : > { %496 = vrot.lane.b32.xlu0 %v329_v26, %s1322_s14 }
 0x290   : > { %v332_v27 = vpop.permute.xlu1 %331  ;;  %v421_v28 = vpop.permute.xlu0 %420 }
 0x291   : > { %1203 = vmatpush3.xpose.msk.msra.mxu1 %vm333_vm2, %v332_v27 }
 0x292   : > { %1207 = vmatprep.subr.mxu1 %v1318_v13 }
 0x294   : > { %1205 = vmatmul.mubr.msk.f32.vlgmr.msra.gmra.mrb[0].mxu1 %vm333_vm2, %v329_v26  ;;  %v499_v38 = vpop.permute.xlu0 %498 }
 0x295   : > { %1208 = vmatpush3.msra.mxu1 %v421_v28  ;;  %1209 = vmatprep.mubr.msk.f32.mxu1 %vm1317_vm1, %v1318_v13 }
 0x296   : > { %1212 = vmatprep.subr.mxu1 %v1318_v13 }
 0x298   : > { %v497_v39 = vpop.permute.xlu0 %496 }
 0x367   : > { %v405_v29 = vpop.f32.mrb[0].mxu1 }
 0x368   : > { %v1206_v30 = vpop.f32.mrb[1].mxu1  ;;  %v409_v31 = vsel %vm333_vm2, %v405_v29, -inf }
 0x369   : > { %410 = vmax.xlane.f32.xlu1 %v409_v31 }
 0x37a   : > { %663 = vrot.lane.b32.xlu1 %v1414_v24, %s1323_s15 }
 0x3f6   : > { %v411_v32 = vpop.xlane.xlu1 %410 }
 0x3f7   : > { %v412_v33 = vsub.f32 %v405_v29, %v411_v32 }
 0x3f9   : > { %v413_v34 = vmul.f32 1.442695, %v412_v33 }
 0x3fa   : > { %v664_v35 = vpop.permute.xlu1 %663 }
 0x3fb   : > { %1292 = vpow2.f32 %v413_v34  ;;  %1223 = vmatpush3.xpose.msk.msra.mxu0 %vm333_vm2, %v664_v35 }
 0x3fc   : > { %1232 = vmatprep.subr.mxu0 %v1318_v13 }
 0x405   : > { %v1293_v36 = vpop.eup %1292 }
 0x406   : > { %v415_v37 = vsel %vm333_vm2, %v1293_v36, 0.0 }
 0x407   : > { %416 = vadd.xlane.f32.xlu0 %v415_v37 }
 0x41d   : > { %661 = vrot.lane.b32.xlu0 %v329_v26, %s1324_s16 }
 0x421   : > { %828 = vrot.lane.b32.xlu0 %v1414_v24, %s1325_s17 }
 0x425   : > { %826 = vrot.lane.b32.xlu0 %v329_v26, %s1326_s21  ;;  %v1010_v26 = vld [vmem:[%s1498_s4 + $0x10] sm:$0xff] }
 0x494   : > { %v417_v40 = vpop.xlane.xlu0 %416 }
 0x495   : > { %1294 = vrcp.f32 %v417_v40 }
 0x498   : > { %v662_v41 = vpop.permute.xlu0 %661 }
 0x499   : > { %1225 = vmatmul.mubr.msk.f32.vlgmr.msra.gmra.mrb[2].mxu0 %vm333_vm2, %v662_v41 }
 0x49a   : > { %1234 = vmatprep.mubr.msk.f32.mxu0 %vm1317_vm1, %v1318_v13 }
 0x49c   : > { %v829_v42 = vpop.permute.xlu0 %828 }
 0x49d   : > { %1233 = vmatpush3.xpose.msk.msra.mxu0 %vm333_vm2, %v829_v42 }
 0x49e   : > { %1259 = vmatprep.subr.bf16.mxu0 %v1316_v10 }
 0x49f   : > { %v1295_v43 = vpop.eup %1294 }
 0x4a0   : > { %v419_v44 = vmul.f32 %v1295_v43, %v1293_v36  ;;  %v827_v45 = vpop.permute.xlu0 %826 }
 0x4a1   : > { %1235 = vmatmul.mubr.msk.f32.vlgmr.msra.gmra.mrb[4].mxu0 %vm333_vm2, %v827_v45 }
 0x4a2   : > { %1210 = vmatmul.mubr.msk.f32.vlgmr.msra.gmra.mrb[2].mxu1 %vm333_vm2, %v419_v44  ;;  %1250 = vmatprep.mubr.msk.f32.mxu0 %vm1317_vm1, %v1318_v13 }
 0x4a3   : > { %1213 = vmatpush3.xpose.msk.msra.mxu1 %vm333_vm2, %v499_v38  ;;  %1214 = vmatprep.mubr.msk.f32.mxu1 %vm1317_vm1, %v1318_v13 }
 0x4a4   : > { %1217 = vmatprep.subr.mxu1 %v1318_v13 }
 0x4a6   : > { %1215 = vmatmul.mubr.msk.f32.vlgmr.msra.gmra.mrb[4].mxu1 %vm333_vm2, %v497_v39 }
 0x4a7   : > { %1219 = vmatprep.mubr.msk.f32.mxu1 %vm1317_vm1, %v1318_v13 }
 0x56c   : > { %v735_v46 = vpop.f32.mrb[2].mxu0 }
 0x56d   : > { %v1226_v47 = vpop.f32.mrb[3].mxu0  ;;  %v739_v48 = vsel %vm333_vm2, %v735_v46, -inf }
 0x56e   : > { %740 = vmax.xlane.f32.xlu1 %v739_v48 }
 0x574   : > { %v900_v49 = vpop.f32.mrb[4].mxu0 }
 0x575   : > { %v1449_v50 = vpop.f32.mrb[2].mxu1  ;;  %v1236_v51 = vpop.f32.mrb[5].mxu0  ;;  %v904_v56 = vsel %vm333_vm2, %v900_v49, -inf }
 0x576   : > { %v1211_v52 = vpop.f32.mrb[3].mxu1 }
 0x579   : > { %v570_v53 = vpop.f32.mrb[4].mxu1 }
 0x57a   : > { %v1216_v54 = vpop.f32.mrb[5].mxu1  ;;  %v574_v55 = vsel %vm333_vm2, %v570_v53, -inf }
 0x57b   : > { %575 = vmax.xlane.f32.xlu0 %v574_v55 }
 0x57f   : > { %905 = vmax.xlane.f32.xlu0 %v904_v56 }
 0x5fb   : > { %v741_v57 = vpop.xlane.xlu1 %740 }
 0x5fc   : > { %v742_v58 = vsub.f32 %v735_v46, %v741_v57 }
 0x5fe   : > { %v743_v59 = vmul.f32 1.442695, %v742_v58 }
 0x600   : > { %1296 = vpow2.f32 %v743_v59 }
 0x608   : > { %v576_v60 = vpop.xlane.xlu0 %575 }
 0x609   : > { %v577_v61 = vsub.f32 %v570_v53, %v576_v60 }
 0x60a   : > { %v1297_v62 = vpop.eup %1296 }
 0x60b   : > { %v578_v63 = vmul.f32 1.442695, %v577_v61  ;;  %v745_v1 = vsel %vm333_vm2, %v1297_v62, 0.0 }
 0x60c   : > { %746 = vadd.xlane.f32.xlu0 %v745_v1  ;;  %v906_v2 = vpop.xlane.xlu0 %905 }
 0x60d   : > { %1298 = vpow2.f32 %v578_v63  ;;  %v907_v3 = vsub.f32 %v900_v49, %v906_v2 }
 0x60f   : > { %v908_v4 = vmul.f32 1.442695, %v907_v3 }
 0x611   : > { %1300 = vpow2.f32 %v908_v4 }
 0x617   : > { %v1299_v5 = vpop.eup %1298 }
 0x618   : > { %v580_v6 = vsel %vm333_vm2, %v1299_v5, 0.0 }
 0x619   : > { %581 = vadd.xlane.f32.xlu0 %v580_v6 }
 0x61b   : > { %v1301_v7 = vpop.eup %1300 }
 0x61c   : > { %v910_v8 = vsel %vm333_vm2, %v1301_v7, 0.0 }
 0x61d   : > { %911 = vadd.xlane.f32.xlu1 %v910_v8 }
 0x62e   : > { %750 = vrot.lane.b32.xlu1 %v1414_v24, %s1327_s22 }
 0x62f   : > { %585 = vrot.lane.b32.xlu0 %v1414_v24, %s1328_s23 }
 0x632   : > { %915 = vrot.lane.b32.xlu1 %v1414_v24, %s1329_s24  ;;  %v1009_v24 = vld [vmem:[%s1498_s4 + $0x8] sm:$0xff] }
 0x633   : > { %v1260_v25 = vpack.c.bf16 %v1009_v24, %v1008_v23 }
 0x635   : > { %1261 = vmatpush3.bf16.msra.mxu0 %v1260_v25 }
 0x636   : > { %1262 = vmatprep.subr.bf16.mxu0 %v1316_v10 }
 0x699   : > { %v747_v9 = vpop.xlane.xlu0 %746 }
 0x6a6   : > { %v582_v11 = vpop.xlane.xlu0 %581 }
 0x6a7   : > { %1302 = vrcp.f32 %v582_v11 }
 0x6a8   : > { %1304 = vrcp.f32 %v747_v9 }
 0x6aa   : > { %v912_v12 = vpop.xlane.xlu1 %911  ;;  %v586_v14 = vpop.permute.xlu0 %585 }
 0x6ab   : > { %1218 = vmatpush3.msra.mxu1 %v586_v14  ;;  %1306 = vrcp.f32 %v912_v12 }
 0x6ac   : > { %1227 = vmatprep.subr.mxu1 %v1318_v13 }
 0x6ae   : > { %v751_v17 = vpop.permute.xlu1 %750 }
 0x6b1   : > { %v1303_v15 = vpop.eup %1302 }
 0x6b2   : > { %v584_v16 = vmul.f32 %v1303_v15, %v1299_v5  ;;  %v1305_v18 = vpop.eup %1304  ;;  %v916_v21 = vpop.permute.xlu1 %915 }
 0x6b3   : > { %v749_v19 = vmul.f32 %v1305_v18, %v1297_v62 }
 0x6b4   : > { %1220 = vmatmul.mubr.msk.f32.vlgmr.msra.gmra.mrb[6].mxu1 %vm333_vm2, %v584_v16 }
 0x6b5   : > { %1228 = vmatpush3.msra.mxu1 %v751_v17  ;;  %1229 = vmatprep.mubr.msk.f32.mxu1 %vm1317_vm1, %v1318_v13  ;;  %v1307_v20 = vpop.eup %1306 }
 0x6b6   : > { %1237 = vmatprep.subr.mxu1 %v1318_v13  ;;  %v914_v22 = vmul.f32 %v1307_v20, %v1301_v7 }
 0x6b8   : > { %1230 = vmatmul.mubr.msk.f32.vlgmr.msra.gmra.mrb[8].mxu1 %vm333_vm2, %v749_v19 }
 0x6b9   : > { %1238 = vmatpush3.msra.mxu1 %v916_v21  ;;  %1239 = vmatprep.mubr.msk.f32.mxu1 %vm1317_vm1, %v1318_v13  ;;  %v1011_v13 = vld [vmem:[%s1498_s4 + $0x18] sm:$0xff] }
 0x6ba   : > { %v1263_v27 = vpack.c.bf16 %v1011_v13, %v1010_v26 }
 0x6bc   : > { %1240 = vmatmul.mubr.msk.f32.vlgmr.msra.gmra.mrb[10].mxu1 %vm333_vm2, %v914_v22  ;;  %1264 = vmatpush3.bf16.msra.mxu0 %v1263_v27 }
 0x787   : > { %v657_v28 = vpop.f32.mrb[6].mxu1 }
 0x788   : > { %992 = vrot.lane.b32.xlu1 %v657_v28, %s1330_s8  ;;  %v1221_v29 = vpop.f32.mrb[7].mxu1 }
 0x78b   : > { %v822_v30 = vpop.f32.mrb[8].mxu1 }
 0x78c   : > { %996 = vrot.lane.b32.xlu0 %v822_v30, %s1331_s9  ;;  %v1231_v31 = vpop.f32.mrb[9].mxu1 }
 0x78f   : > { %v987_v10 = vpop.f32.mrb[10].mxu1 }
 0x790   : > { %1000 = vrot.lane.b32.xlu1 %v987_v10, %s1332_s10  ;;  %v1241_v32 = vpop.f32.mrb[11].mxu1 }
 0x7fa   : > { %v993_v33 = vpop.permute.xlu1 %992 }
 0x7fb   : > { %v1003_v35 = vsel %vm333_vm2, %v1449_v50, %v993_v33 }
 0x7fe   : > { %v997_v34 = vpop.permute.xlu0 %996 }
 0x7ff   : > { %v1005_v36 = vsel %vm1004_vm3, %v1003_v35, %v997_v34 }
 0x802   : > { %v1001_v37 = vpop.permute.xlu1 %1000 }
 0x803   : > { %v1007_v38 = vsel %vm1006_vm4, %v1005_v36, %v1001_v37 }
 0x804   : > { %1251 = vmatmul.mubr.msk.f32.vlgmr.msra.gmra.mrb[6].mxu0 %vm223_vm0, %v1007_v38 }
 0x8d7   : > { %v1081_v39 = vpop.f32.mrb[6].mxu0 }
 0x8d8   : > { %v1085_v40 = vadd.f32 %v1081_v39, %v1379_v0  ;;  %v1252_v41 = vpop.f32.mrb[7].mxu0 }
 0x8da   : > { %1086 = vst.msk [vmem:[%s219_s13] sm:$0xff] %vm223_vm0, %v1085_v40 }
 0x8db PF: > { %s15_s18 = sadd.s32 1, %s1314_s18  }
 0x8dc   : > { %p12_p4 = scmp.ge.s32.totalorder %s15_s18, 4  }
 0x8de   :  { %14 = sbr.rel (!%p12_p4) target bundleno = 1 (0x1), region = 70 }

// kernel: dec_sa_layer.4
= control target key start
LH: loop header
LB: loop body
LE: loop exit
PB: predicated region body
PF: predicated region fallthrough
CT: control target
= control target key end

     0   :  { %15 = vsyncpa [#allocation3], 0  ;;  %s2612_s0 = inlined_call_operand.vmem [shape: f32[2,8,32], index: 0, kind: input, shape index: {}]   ;;  %s2613_s1 = inlined_call_operand.vmem [shape: f32[2,12,32], index: 1, kind: input, shape index: {}]   ;;  %s2614_s2 = inlined_call_operand.vmem [shape: f32[1,32], index: 2, kind: input, shape index: {}]   ;;  %s2615_s3 = inlined_call_operand.vmem [shape: f32[1,32], index: 3, kind: input, shape index: {}]   ;;  %s2616_s4 = inlined_call_operand.vmem [shape: f32[32,32], index: 4, kind: input, shape index: {}]   ;;  %s2617_s5 = inlined_call_operand.hbm [shape: f32[32,32], index: 5, kind: input, shape index: {}]   ;;  %s2618_s6 = inlined_call_operand.hbm [shape: f32[32,32], index: 6, kind: input, shape index: {}]   ;;  %s2619_s7 = inlined_call_operand.hbm [shape: f32[32,32], index: 7, kind: input, shape index: {}]   ;;  %s2620_s8 = inlined_call_operand.vmem [shape: f32[2,8,32], index: 8, kind: output, shape index: {0}]   ;;  %s2621_s9 = inlined_call_operand.hbm [shape: f32[2,4,8,12], index: 9, kind: output, shape index: {1}]  }
   0x1   :  { %16 = vsyncpa [#allocation6], 0 }
   0x2   :  { %17 = vsyncpa [#allocation4], 0 }
   0x3   :  { %19 = vsyncpa [#allocation4 + $0x1], 0  ;;  %s2234_s30 = smov 0   ;;  %s2236_s10 = smov 0  }
   0x4   :  { %s2238_s11 = smov 0   ;;  %s2240_s12 = smov 0  }
   0x5 LB: > { %2630 = sst [smem:[#allocation12_spill]] %s2153_s30  ;;  %s2255_s13 = sadd.s32 4294967295, %s2165_s12   ;;  %s2165_s12 = sphi %s2240_s12, %s2653_s12   ;;  %s2161_s11 = sphi %s2238_s11, %s2655_s11   ;;  %s2157_s10 = sphi %s2236_s10, %s2657_s10   ;;  %s2153_s30 = sphi %s2234_s30, %s2656_s30  }
   0x6   : > { %2631 = sst [smem:[#allocation13_spill]] %s2161_s11  ;;  %s1621_s14 = sadd.s32 4294967294, %s2165_s12  }
   0x7   : > { %s2259_s15 = sadd.s32 1, %s2165_s12   ;;  %s236_s16 = sadd.s32 1, %s2161_s11 }
   0x8   : > { %2632 = sst [smem:[#allocation14_spill]] %s2259_s15  ;;  %s233_s17 = ssub.s32 %s2165_s12, %s2259_s15 }
   0x9   : > { %p246_p0 = scmp.ne.s32.totalorder %s2161_s11, %s2157_s10  ;;  %p234_p1 = scmp.eq.s32.totalorder %s233_s17, 0 }
   0xa   : > { %p247_p2 = scmp.eq.s32.totalorder %s2255_s13, 1  ;;  %p252_p3 = scmp.ne.s32.totalorder %s2157_s10, %s2153_s30 }
   0xb   : > { %p253_p4 = scmp.eq.s32.totalorder %s1621_s14, 1  ;;  %p1622_p7 = scmp.ge.s32.totalorder %s2165_s12, 1 }
   0xc   : > { %s2270_s18 = scalar_select %p234_p1, %s2161_s11, %s236_s16  }
   0xd   : > { %p2272_p5 = por %p247_p2, %p246_p0  ;;  %p2276_p6 = por %p253_p4, %p252_p3 }
   0xe   : > { %2633 = sst [smem:[#allocation15_spill]] %s2270_s18  ;;  %p260_p8 = scmp.lt.s32.totalorder %s2165_s12, 3 }
   0xf   : > { %s2634_s19 = scalar_select %p2272_p5, 1, 0 }
  0x10   : > { %s2635_s20 = scalar_select %p2276_p6, 1, 0 }
  0x11   : > { %p2622_p9 = scmp.eq.s32.totalorder %s2255_s13, 0  ;;  %p2283_p10 = pnand %p1622_p7, %p260_p8 }
  0x12   : > { %2636 = sst [smem:[#allocation16_spill]] %s2635_s20  ;;  %s2167_s22 = smov [#allocation5]  }
  0x13   : > { %s2637_s21 = scalar_select %p2283_p10, 1, 0 }
  0x14   : > { %p1894_p11 = pneg %p2283_p10  ;;  %s294_s23 = sshll.u32 %s2167_s22, 4  ;;  %s2289_s23 = int_to_ptr.vmem [resolvable:$true] %s294_s23 }
  0x15   : > { %s2168_s25 = smov [#allocation2]   ;;  %s2169_s27 = smov [#allocation7]  }
  0x16   : > { %p2293_p12 = pnand %p2622_p9, %p1894_p11  ;;  %s281_s26 = sshll.u32 %s2168_s25, 4  ;;  %s2297_s26 = int_to_ptr.vmem [resolvable:$true] %s281_s26 }
  0x17   : > { %s2299_s28 = sshll.u32 %s2169_s27, 4  ;;  %s2011_s16 = scalar_lea.hbm %s2618_s6, 512  ;;  %s308_s28 = int_to_ptr.vmem [resolvable:$true] %s2299_s28 }
  0x18   : > { %p2012_p13 = scmp.ne.s32.totalorder %s2618_s6, %s2011_s16  ;;  %p2309_p0 = pneg %p2293_p12 }
  0x19   : > { %p2018_p3 = scmp.lt.u32.totalorder %s2011_s16, %s2618_s6 }
  0x1a   : > { %p2014_p1 = pnand %p2309_p0, %p2012_p13 }
  0x1c   : > { %p2015_p2 = pneg %p2014_p1 }
  0x1e   : > { %p2020_p4 = pnand %p2018_p3, %p2015_p2 }
  0x20   : > { %2023 = shalt.err (!%p2020_p4)
}
  0x21   : > { %s2024_s29 = scalar_lea.vmem %s2289_s23, 512  ;;  %p2032_p9 = scmp.lt.s32.totalorder %s2289_s23, %s2289_s23 }
  0x22   : > { %p2025_p7 = scmp.ne.s32.totalorder %s2289_s23, %s2024_s29  ;;  %p2033_p6 = scmp.lt.s32.totalorder %s2024_s29, %s2024_s29 }
  0x24   : > { %p2027_p8 = pnand %p2025_p7, %p2309_p0  ;;  %p2034_p13 = por %p2033_p6, %p2032_p9 }
  0x26   : > { %p2028_p11 = pneg %p2027_p8 }
  0x28   : > { %p2035_p1 = pnand %p2034_p13, %p2028_p11 }
  0x2a   : > { %2038 = shalt.err (!%p2035_p1)
}
  0x2b   : > { %s2170_s14 = smov 128   ;;  %s2171_s16 = smov 8  }
  0x2c   : > { %1900 = dma.hbm_to_vmem [thread:$0]  (!%p2293_p12), %s2618_s6, 512, %s2289_s23, [#allocation6], %s2170_s14, %s2170_s14, %s2171_s16  }
  0x2d   : > { %s2039_s29 = scalar_lea.hbm %s2617_s5, 512 }
  0x2e   : > { %p2040_p6 = scmp.ne.s32.totalorder %s2617_s5, %s2039_s29  ;;  %p2046_p3 = scmp.lt.u32.totalorder %s2039_s29, %s2617_s5 }
  0x30   : > { %p2042_p9 = pnand %p2040_p6, %p2309_p0 }
  0x32   : > { %p2043_p2 = pneg %p2042_p9 }
  0x34   : > { %p2048_p4 = pnand %p2046_p3, %p2043_p2 }
  0x36   : > { %2051 = shalt.err (!%p2048_p4)
}
  0x37   : > { %s2052_s23 = scalar_lea.vmem %s2297_s26, 512  ;;  %p2060_p13 = scmp.lt.s32.totalorder %s2297_s26, %s2297_s26 }
  0x38   : > { %p2053_p7 = scmp.ne.s32.totalorder %s2297_s26, %s2052_s23  ;;  %p2061_p1 = scmp.lt.s32.totalorder %s2052_s23, %s2052_s23 }
  0x3a   : > { %p2055_p8 = pnand %p2053_p7, %p2309_p0  ;;  %p2062_p6 = por %p2061_p1, %p2060_p13 }
  0x3c   : > { %p2056_p11 = pneg %p2055_p8 }
  0x3e   : > { %p2063_p9 = pnand %p2062_p6, %p2056_p11 }
  0x40   : > { %2066 = shalt.err (!%p2063_p9)
}
  0x41   : > { %1897 = dma.hbm_to_vmem [thread:$0]  (!%p2293_p12), %s2617_s5, 512, %s2297_s26, [#allocation3], %s2170_s14, %s2170_s14, %s2171_s16  }
  0x42   : > { %s2067_s17 = scalar_lea.hbm %s2619_s7, 512 }
  0x43   : > { %p2068_p2 = scmp.ne.s32.totalorder %s2619_s7, %s2067_s17  ;;  %p2074_p7 = scmp.lt.u32.totalorder %s2067_s17, %s2619_s7 }
  0x45   : > { %p2070_p3 = pnand %p2068_p2, %p2309_p0 }
  0x47   : > { %p2071_p4 = pneg %p2070_p3 }
  0x49   : > { %p2076_p8 = pnand %p2074_p7, %p2071_p4 }
  0x4b   : > { %2079 = shalt.err (!%p2076_p8)
}
  0x4c   : > { %s2080_s23 = scalar_lea.vmem %s308_s28, 512  ;;  %p2088_p6 = scmp.lt.s32.totalorder %s308_s28, %s308_s28 }
  0x4d   : > { %p2081_p11 = scmp.ne.s32.totalorder %s308_s28, %s2080_s23  ;;  %p2089_p9 = scmp.lt.s32.totalorder %s2080_s23, %s2080_s23 }
  0x4f   : > { %p2083_p13 = pnand %p2081_p11, %p2309_p0  ;;  %p2090_p5 = por %p2089_p9, %p2088_p6 }
  0x51   : > { %p2084_p1 = pneg %p2083_p13 }
  0x53   : > { %p2091_p10 = pnand %p2090_p5, %p2084_p1 }
  0x55   : > { %2094 = shalt.err (!%p2091_p10)
}
  0x56   : > { %1903 = dma.hbm_to_vmem [thread:$0]  (!%p2293_p12), %s2619_s7, 512, %s308_s28, [#allocation6], %s2170_s14, %s2170_s14, %s2171_s16  }
  0x57   : > { %p2640_p2 = scmp.ne.s32.totalorder %s2637_s21, 0 }
  0x58   : > { %p2641_p0 = scmp.eq.s32.totalorder (!%p2640_p2), %s2255_s13, 0 }
  0x59   : > { %338 = sbr.rel (%p2640_p2) target bundleno = 3311 (0xcef), region = 52 }
  0x60   : > { %2140 = dma.done.wait (%p2641_p0), [#allocation3], 512   ;;  %p2642_p3 = pmov %p2641_p0 }
  0x61   : > { %p2643_p5 = pmov %p2641_p0 }
  0x62   : > { %2142 = vsyncadd (%p2642_p3), [#allocation3], 4294966784 }
  0x63   : > { %2144 = dma.done.wait (%p2643_p5), [#allocation6], 1024   ;;  %p2644_p10 = pmov %p2641_p0 }
  0x64   : > { %p390_p4 = scmp.lt.s32.totalorder %s2255_s13, 1  ;;  %vm408_vm0 = vcmask 261120   ;;  %v514_v7 = vld [vmem:[#allocation2] sm:$0xff]  ;;  %v515_v8 = vld [vmem:[#allocation2 + $0x8] sm:$0xff]  ;;  %v516_v10 = vld [vmem:[#allocation2 + $0x10] sm:$0xff]  ;;  %v2172_v14 = vmov 0.0|0.0  }
  0x65   : > { %2146 = vsyncadd (%p2644_p10), [#allocation6], 4294966272  ;;  %v1826_v9 = vpack.c.bf16 %v515_v8, %v514_v7  ;;  %v517_v11 = vld [vmem:[#allocation2 + $0x18] sm:$0xff]  ;;  %v437_v12 = vld [vmem:[%s2616_s4] sm:$0xff]  ;;  %1820 = vmatprep.subr.bf16.mxu0 %v2172_v14  ;;  %vm2173_vm1 = vmmov 0   ;;  %v2174_v20 = vmov 0.0  }
  0x66   : > { %s2393_s18 = scalar_select %p390_p4, %s2255_s13, 1  ;;  %v1830_v13 = vpack.c.bf16 %v517_v11, %v516_v10  ;;  %v438_v15 = vld [vmem:[%s2616_s4 + $0x8] sm:$0xff]  ;;  %v439_v16 = vld [vmem:[%s2616_s4 + $0x10] sm:$0xff]  ;;  %v440_v17 = vld [vmem:[%s2616_s4 + $0x18] sm:$0xff]  ;;  %1728 = vmatprep.mubr.msk.f32.mxu0 %vm2173_vm1, %v2174_v20  ;;  %vm679_vm2 = vcmask 64512   ;;  %vm759_vm4 = vcmask 97280  }
  0x67   : > { %1827 = vmatprep.subr.bf16.mxu1 %v1826_v9  ;;  %v1821_v19 = vpack.c.bf16 %v438_v15, %v437_v12  ;;  %v1824_v21 = vpack.c.bf16 %v440_v17, %v439_v16  ;;  %v1636_v27 = vld [vmem:[%s2614_s2] ss:$0 sm:$0xff]  ;;  %vm2442_vm3 = vmpackc.low %vm679_vm2, %vm679_vm2  ;;  %s2175_s11 = smov 120   ;;  %v600_v41 = vld [vmem:[#allocation5 + $0x8] sm:$0xff]  ;;  %s387_s15 = sand.u32 1, %s2157_s10   ;;  %vm775_vm5 = vcmask 1043456  }
  0x68   : > { %s1632_s21 = sshll.u32 %s2393_s18, 3  ;;  %s1672_s16 = sshll.u32 %s2393_s18, 4  ;;  %1829 = vmatpush3.bf16.msra.mxu1 %v1826_v9  ;;  %v1637_v29 = vld [vmem:[%s2615_s3] ss:$0 sm:$0xff]  ;;  %v601_v42 = vld [vmem:[#allocation5 + $0x10] sm:$0xff]  ;;  %v602_v44 = vld [vmem:[#allocation5 + $0x18] sm:$0xff] }
  0x69   : > { %s393_s14 = scalar_lea.vmem %s2612_s0, %s1632_s21  ;;  %s398_s22 = scalar_lea.vmem %s2613_s1, %s1672_s16  ;;  %1831 = vmatprep.subr.bf16.mxu1 %v1830_v13  ;;  %1822 = vmatpush3.bf16.msra.mxu0 %v1821_v19  ;;  %v599_v40 = vld [vmem:[#allocation5] sm:$0xff]  ;;  %v1838_v45 = vpack.c.bf16 %v602_v44, %v601_v42  ;;  %vm2176_vm6 = vmmov 1   ;;  %vm1388_vm8 = vcmask 130048   ;;  %vm1390_vm9 = vcmask 195584  }
  0x6a   : > { %v2401_v0 = vld [vmem:[%s393_s14] sm:$0xff]  ;;  %v405_v22 = vld [vmem:[%s398_s22 + $0x8] sm:$0xf]  ;;  %1823 = vmatprep.subr.bf16.mxu0 %v2172_v14  ;;  %v1834_v43 = vpack.c.bf16 %v600_v41, %v599_v40  ;;  %s1631_s20 = sshll.u32 %s387_s15, 5  ;;  %vm2472_vm7 = vmpackc.low %vm775_vm5, %vm2176_vm6  ;;  %s2178_s25 = smov 104  }
  0x6b   : > { %v409_v1 = vsel %vm408_vm0, %v2401_v0, 0.0  ;;  %v404_v18 = vld [vmem:[%s398_s22] sm:$0xff]  ;;  %s2466_s17 = scalar_lea.vmem [#allocation8], %s1631_s20  ;;  %s2177_s22 = smov 112  }
  0x6c   : > { %410 = vadd.xlane.f32.xlu0 %v409_v1  ;;  %1739 = vmatprep.mubr.msk.f32.mxu1 %vm408_vm0, %v404_v18  ;;  %s2179_s27 = smov 16   ;;  %s2180_s29 = smov 8   ;;  %v1392_v57 = vld [vmem:[#allocation7] sm:$0xff] }
  0x6d   : > { %1833 = vmatpush3.bf16.msra.mxu1 %v1830_v13  ;;  %1825 = vmatpush3.bf16.msra.mxu0 %v1824_v21  ;;  %s2181_s23 = smov 24   ;;  %s1492_s26 = sshll.u32 %s2466_s17, 4  ;;  %s2553_s26 = int_to_ptr.vmem [resolvable:$true] %s1492_s26 }
  0x6e   : > { %1842 = vmatprep.subr.bf16.mxu1 %v2172_v14  ;;  %1835 = vmatprep.subr.bf16.mxu0 %v1834_v43  ;;  %s1673_s30 = sshll.u32 %s2255_s13, 9  ;;  %s2563_s16 = scalar_lea.sflag [#allocation4], %s387_s15 }
  0x6f   : > { %s2559_s14 = scalar_lea.hbm %s2621_s9, %s1673_s30  ;;  %p2649_p7 = scmp.ne.s32.totalorder %s2634_s19, 0 }
  0x70   : > { %1740 = vmatmul.mubr.msk.f32.vlgmr.msra.gmra.mrb[0].mxu1 %vm408_vm0, %v405_v22  ;;  %s2182_s20 = smov [#allocation8]  }
  0x71   : > { %1757 = vmatprep.mubr.msk.f32.mxu1 %vm2173_vm1, %v2174_v20 }
  0xf9   : > { %v411_v2 = vpop.xlane.xlu0 %410 }
  0xfa   : > { %v413_v3 = vmul.f32 0.03125, %v411_v2 }
  0xfc   : > { %v414_v4 = vsub.f32 %v2401_v0, %v413_v3 }
  0xfe   : > { %v415_v5 = vmul.f32 %v414_v4, %v414_v4 }
 0x100   : > { %v416_v6 = vsel %vm408_vm0, %v415_v5, 0.0 }
 0x101   : > { %417 = vadd.xlane.f32.xlu0 %v416_v6 }
 0x143   : > { %v1741_v32 = vpop.f32.mrb[0].mxu1 }
 0x144   : > { %v590_v33 = vpop.f32.mrb[1].mxu1 }
 0x145   : > { %v1843_v35 = vpack.c.bf16 %v1741_v32, %v590_v33  ;;  %v2446_v36 = vpack.i.bf16 %v1741_v32, %v590_v33 }
 0x147   : > { %1845 = vmatpush3.bf16.xpose.msk.msra.mxu1 %vm2442_vm3, %v1843_v35  ;;  %1964 = vrot.lane.b32.xlu0 %v2446_v36, %s2175_s11 }
 0x148   : > { %1846 = vmatprep.subr.bf16.mxu1 %v2172_v14 }
 0x18e   : > { %v418_v23 = vpop.xlane.xlu0 %417 }
 0x18f   : > { %v419_v24 = vmul.f32 0.03125, %v418_v23 }
 0x191   : > { %v420_v25 = vadd.f32 1e-05, %v419_v24 }
 0x193   : > { %1993 = vrsqrt.f32 %v420_v25 }
 0x19d   : > { %v1994_v26 = vpop.eup %1993 }
 0x19e   : > { %v422_v28 = vmul.f32 %v1994_v26, %v414_v4 }
 0x1a0   : > { %v429_v30 = vmul.f32 %v1636_v27, %v422_v28 }
 0x1a2   : > { %v436_v31 = vadd.f32 %v1637_v29, %v429_v30 }
 0x1a4   : > { %1729 = vmatmul.mubr.msk.f32.vlgmr.msra.gmra.mrb[0].mxu0 %vm408_vm0, %v436_v31 }
 0x1a5   : > { %1750 = vmatprep.mubr.msk.f32.mxu0 %vm408_vm0, %v404_v18  ;;  %1837 = vmatpush3.bf16.msra.mxu0 %v1834_v43 }
 0x1a6   : > { %1839 = vmatprep.subr.bf16.mxu0 %v1838_v45 }
 0x1a9   : > { %1841 = vmatpush3.bf16.msra.mxu0 %v1838_v45 }
 0x1aa   : > { %1854 = vmatprep.subr.bf16.mxu0 %v2172_v14 }
 0x1ac   : > { %1751 = vmatmul.mubr.msk.f32.vlgmr.msra.gmra.mrb[2].mxu0 %vm408_vm0, %v405_v22 }
 0x1ad   : > { %1778 = vmatprep.mubr.msk.f32.mxu0 %vm2173_vm1, %v2174_v20 }
 0x1b9   : > { %v1965_v60 = vpop.permute.xlu0 %1964 }
 0x1ba   : > { %v1967_v61 = vunpack.i.h.bf16 %v1965_v60  ;;  %v1966_v62 = vunpack.i.l.bf16 %v1965_v60 }
 0x1bc   : > { %v1851_v2 = vpack.c.bf16 %v1967_v61, %v1966_v62 }
 0x277   : > { %v510_v37 = vpop.f32.mrb[0].mxu0 }
 0x278   : > { %v2453_v38 = vmul.f32 0.35355338, %v510_v37  ;;  %v1730_v39 = vpop.f32.mrb[1].mxu0 }
 0x27a   : > { %1758 = vmatmul.mubr.msk.f32.vlgmr.msra.gmra.mrb[2].mxu1 %vm679_vm2, %v2453_v38 }
 0x27b   : > { %1764 = vmatprep.mubr.msk.f32.mxu1 %vm2173_vm1, %v2174_v20 }
 0x27f   : > { %v1752_v54 = vpop.f32.mrb[2].mxu0 }
 0x280   : > { %v669_v55 = vpop.f32.mrb[3].mxu0 }
 0x281   : > { %v1847_v56 = vpack.c.bf16 %v1752_v54, %v669_v55  ;;  %v2476_v58 = vpack.i.bf16 %v1752_v54, %v669_v55 }
 0x283   : > { %1849 = vmatpush3.bf16.msk.msra.mxu1 %vm2472_vm7, %v1847_v56 }
 0x284   : > { %1850 = vmatprep.subr.bf16.mxu1 %v2172_v14 }
 0x34d   : > { %v755_v46 = vpop.f32.mrb[2].mxu1 }
 0x34e   : > { %760 = vst.msk [vmem:[%s2466_s17] sm:$0xff] %vm759_vm4, %v755_v46  ;;  %v1759_v47 = vpop.f32.mrb[3].mxu1  ;;  %v761_v48 = vsel %vm759_vm4, %v755_v46, -inf }
 0x34f   : > { %762 = vmax.xlane.f32.xlu1 %v761_v48 }
 0x3dc   : > { %v763_v49 = vpop.xlane.xlu1 %762 }
 0x3dd   : > { %v764_v50 = vsub.f32 %v755_v46, %v763_v49 }
 0x3df   : > { %v765_v51 = vmul.f32 1.442695, %v764_v50 }
 0x3e1   : > { %1995 = vpow2.f32 %v765_v51 }
 0x3eb   : > { %v1996_v52 = vpop.eup %1995 }
 0x3ec   : > { %v767_v53 = vsel %vm759_vm4, %v1996_v52, 0.0 }
 0x3ed   : > { %768 = vadd.xlane.f32.xlu1 %v767_v53 }
 0x3fe   : > { %849 = vrot.lane.b32.xlu1 %v2453_v38, %s2175_s11 }
 0x47a   : > { %v769_v59 = vpop.xlane.xlu1 %768 }
 0x47b   : > { %1997 = vrcp.f32 %v769_v59 }
 0x47e   : > { %v850_v3 = vpop.permute.xlu1 %849 }
 0x485   : > { %v1998_v63 = vpop.eup %1997 }
 0x486   : > { %v771_v1 = vmul.f32 %v1998_v63, %v1996_v52 }
 0x488   : > { %1765 = vmatmul.mubr.msk.f32.vlgmr.msra.gmra.mrb[4].mxu1 %vm759_vm4, %v771_v1 }
 0x489   : > { %1853 = vmatpush3.bf16.xpose.msk.msra.mxu1 %vm2442_vm3, %v1851_v2  ;;  %1771 = vmatprep.mubr.msk.f32.mxu1 %vm2173_vm1, %v2174_v20 }
 0x48a   : > { %1862 = vmatprep.subr.bf16.mxu1 %v2172_v14 }
 0x490   : > { %1772 = vmatmul.mubr.msk.f32.vlgmr.msra.gmra.mrb[6].mxu1 %vm679_vm2, %v850_v3 }
 0x491   : > { %1792 = vmatprep.mubr.msk.f32.mxu1 %vm2173_vm1, %v2174_v20 }
 0x55b   : > { %v2492_v4 = vpop.f32.mrb[4].mxu1 }
 0x55c   : > { %v1766_v5 = vpop.f32.mrb[5].mxu1 }
 0x563   : > { %v927_v6 = vpop.f32.mrb[6].mxu1 }
 0x564   : > { %1651 = vst.msk [vmem:[%s2466_s17 + $0x8] sm:$0xff] %vm759_vm4, %v927_v6  ;;  %v1773_v7 = vpop.f32.mrb[7].mxu1  ;;  %v933_v8 = vsel %vm759_vm4, %v927_v6, -inf }
 0x565   : > { %934 = vmax.xlane.f32.xlu1 %v933_v8  ;;  %v1394_v7 = vld [vmem:[#allocation7 + $0x10] sm:$0xff] }
 0x576   : > { %1974 = vrot.lane.b32.xlu1 %v2446_v36, %s2177_s22 }
 0x57a   : > { %1025 = vrot.lane.b32.xlu1 %v2453_v38, %s2177_s22 }
 0x5f2   : > { %v935_v9 = vpop.xlane.xlu1 %934 }
 0x5f3   : > { %v936_v10 = vsub.f32 %v927_v6, %v935_v9  ;;  %v1393_v6 = vld [vmem:[#allocation7 + $0x8] sm:$0xff]  ;;  %v1395_v9 = vld [vmem:[#allocation7 + $0x18] sm:$0xff] }
 0x5f4   : > { %v1875_v8 = vpack.c.bf16 %v1393_v6, %v1392_v57 }
 0x5f5   : > { %v937_v11 = vmul.f32 1.442695, %v936_v10  ;;  %v1878_v10 = vpack.c.bf16 %v1395_v9, %v1394_v7 }
 0x5f6   : > { %v1975_v21 = vpop.permute.xlu1 %1974 }
 0x5f7   : > { %1999 = vpow2.f32 %v937_v11  ;;  %v1977_v23 = vunpack.i.h.bf16 %v1975_v21  ;;  %v1976_v24 = vunpack.i.l.bf16 %v1975_v21 }
 0x5f9   : > { %v1859_v26 = vpack.c.bf16 %v1977_v23, %v1976_v24 }
 0x5fa   : > { %v1026_v27 = vpop.permute.xlu1 %1025 }
 0x601   : > { %v2000_v12 = vpop.eup %1999 }
 0x602   : > { %v939_v13 = vsel %vm759_vm4, %v2000_v12, 0.0 }
 0x603   : > { %940 = vadd.xlane.f32.xlu0 %v939_v13 }
 0x619   : > { %1969 = vrot.lane.b32.xlu0 %v2476_v58, %s2175_s11  ;;  %s2095_s11 = scalar_lea.vmem %s2553_s26, 512 }
 0x61a   : > { %p2096_p12 = scmp.ne.s32.totalorder %s2553_s26, %s2095_s11 }
 0x61c   : > { %p2097_p8 = pnand %p2096_p12, %p2649_p7 }
 0x61e   : > { %p2098_p11 = pneg %p2097_p8 }
 0x690   : > { %v941_v15 = vpop.xlane.xlu0 %940 }
 0x691   : > { %2001 = vrcp.f32 %v941_v15 }
 0x694   : > { %v1970_v16 = vpop.permute.xlu0 %1969 }
 0x695   : > { %v1972_v17 = vunpack.i.h.bf16 %v1970_v16  ;;  %v1971_v18 = vunpack.i.l.bf16 %v1970_v16 }
 0x697   : > { %v1855_v19 = vpack.c.bf16 %v1972_v17, %v1971_v18 }
 0x699   : > { %1857 = vmatpush3.bf16.msk.msra.mxu0 %vm2472_vm7, %v1855_v19 }
 0x69a   : > { %1858 = vmatprep.subr.bf16.mxu0 %v2172_v14 }
 0x69b   : > { %v2002_v22 = vpop.eup %2001 }
 0x69c   : > { %v943_v25 = vmul.f32 %v2002_v22, %v2000_v12 }
 0x69e   : > { %1779 = vmatmul.mubr.msk.f32.vlgmr.msra.gmra.mrb[4].mxu0 %vm759_vm4, %v943_v25 }
 0x69f   : > { %1785 = vmatprep.mubr.msk.f32.mxu0 %vm2173_vm1, %v2174_v20 }
 0x6a2   : > { %1861 = vmatpush3.bf16.xpose.msk.msra.mxu0 %vm2442_vm3, %v1859_v26 }
 0x6a3   : > { %1870 = vmatprep.subr.bf16.mxu0 %v2172_v14 }
 0x6a9   : > { %1786 = vmatmul.mubr.msk.f32.vlgmr.msra.gmra.mrb[6].mxu0 %vm679_vm2, %v1026_v27 }
 0x6aa   : > { %1806 = vmatprep.mubr.msk.f32.mxu0 %vm2173_vm1, %v2174_v20 }
 0x771   : > { %v1021_v28 = vpop.f32.mrb[4].mxu0 }
 0x772   : > { %v1780_v29 = vpop.f32.mrb[5].mxu0 }
 0x77c   : > { %v1103_v30 = vpop.f32.mrb[6].mxu0 }
 0x77d   : > { %1657 = vst.msk [vmem:[%s2466_s17 + $0x10] sm:$0xff] %vm759_vm4, %v1103_v30  ;;  %v1787_v31 = vpop.f32.mrb[7].mxu0  ;;  %v1109_v32 = vsel %vm759_vm4, %v1103_v30, -inf }
 0x77e   : > { %1110 = vmax.xlane.f32.xlu1 %v1109_v32 }
 0x78f   : > { %1984 = vrot.lane.b32.xlu1 %v2446_v36, %s2178_s25 }
 0x793   : > { %1200 = vrot.lane.b32.xlu1 %v2453_v38, %s2178_s25 }
 0x80b   : > { %v1111_v33 = vpop.xlane.xlu1 %1110 }
 0x80c   : > { %v1112_v35 = vsub.f32 %v1103_v30, %v1111_v33 }
 0x80e   : > { %v1113_v37 = vmul.f32 1.442695, %v1112_v35 }
 0x80f   : > { %v1985_v45 = vpop.permute.xlu1 %1984 }
 0x810   : > { %2003 = vpow2.f32 %v1113_v37  ;;  %v1987_v46 = vunpack.i.h.bf16 %v1985_v45  ;;  %v1986_v47 = vunpack.i.l.bf16 %v1985_v45 }
 0x812   : > { %v1867_v49 = vpack.c.bf16 %v1987_v46, %v1986_v47 }
 0x813   : > { %v1201_v50 = vpop.permute.xlu1 %1200 }
 0x81a   : > { %v2004_v39 = vpop.eup %2003 }
 0x81b   : > { %v1115_v40 = vsel %vm759_vm4, %v2004_v39, 0.0 }
 0x81c   : > { %1116 = vadd.xlane.f32.xlu0 %v1115_v40 }
 0x832   : > { %1979 = vrot.lane.b32.xlu0 %v2476_v58, %s2177_s22 }
 0x8a9   : > { %v1117_v41 = vpop.xlane.xlu0 %1116 }
 0x8aa   : > { %2005 = vrcp.f32 %v1117_v41 }
 0x8ad   : > { %v1980_v42 = vpop.permute.xlu0 %1979 }
 0x8ae   : > { %v1982_v43 = vunpack.i.h.bf16 %v1980_v42  ;;  %v1981_v44 = vunpack.i.l.bf16 %v1980_v42 }
 0x8b0   : > { %v1863_v36 = vpack.c.bf16 %v1982_v43, %v1981_v44 }
 0x8b2   : > { %1865 = vmatpush3.bf16.msk.msra.mxu1 %vm2472_vm7, %v1863_v36 }
 0x8b3   : > { %1866 = vmatprep.subr.bf16.mxu1 %v2172_v14 }
 0x8b4   : > { %v2006_v38 = vpop.eup %2005 }
 0x8b5   : > { %v1119_v48 = vmul.f32 %v2006_v38, %v2004_v39 }
 0x8b7   : > { %1793 = vmatmul.mubr.msk.f32.vlgmr.msra.gmra.mrb[8].mxu1 %vm759_vm4, %v1119_v48 }
 0x8b8   : > { %1799 = vmatprep.mubr.msk.f32.mxu1 %vm2173_vm1, %v2174_v20 }
 0x8bb   : > { %1869 = vmatpush3.bf16.xpose.msk.msra.mxu1 %vm2442_vm3, %v1867_v49 }
 0x8c2   : > { %1800 = vmatmul.mubr.msk.f32.vlgmr.msra.gmra.mrb[10].mxu1 %vm679_vm2, %v1201_v50 }
 0x98a   : > { %v1196_v51 = vpop.f32.mrb[8].mxu1 }
 0x98b   : > { %v1794_v52 = vpop.f32.mrb[9].mxu1 }
 0x995   : > { %v1278_v53 = vpop.f32.mrb[10].mxu1 }
 0x996   : > { %1663 = vst.msk [vmem:[%s2466_s17 + $0x18] sm:$0xff] %vm759_vm4, %v1278_v53  ;;  %v1801_v54 = vpop.f32.mrb[11].mxu1  ;;  %v1284_v55 = vsel %vm759_vm4, %v1278_v53, -inf  ;;  %s2099_s17 = sshll.u32 %s2182_s20, 4  ;;  %s2100_s17 = int_to_ptr.vmem [resolvable:$false] %s2099_s17 }
 0x997   : > { %1285 = vmax.xlane.f32.xlu0 %v1284_v55  ;;  %s2101_s22 = scalar_lea.vmem %s2100_s17, 1024  ;;  %p2102_p13 = scmp.lt.s32.totalorder %s2553_s26, %s2100_s17 }
 0x998   : > { %p2103_p1 = scmp.lt.s32.totalorder %s2101_s22, %s2095_s11 }
 0x99a   : > { %p2104_p6 = por %p2103_p1, %p2102_p13 }
 0x99c   : > { %p2105_p9 = pnand %p2104_p6, %p2098_p11 }
 0x9ad   : > { %1989 = vrot.lane.b32.xlu0 %v2476_v58, %s2178_s25 }
 0x9b1   : > { %1380 = vrot.lane.b32.xlu0 %v1196_v51, %s2179_s27 }
 0xa24   : > { %v1286_v56 = vpop.xlane.xlu0 %1285 }
 0xa25   : > { %v1287_v34 = vsub.f32 %v1278_v53, %v1286_v56 }
 0xa27   : > { %v1288_v59 = vmul.f32 1.442695, %v1287_v34 }
 0xa28   : > { %v1990_v60 = vpop.permute.xlu0 %1989 }
 0xa29   : > { %2007 = vpow2.f32 %v1288_v59  ;;  %v1992_v61 = vunpack.i.h.bf16 %v1990_v60  ;;  %v1991_v62 = vunpack.i.l.bf16 %v1990_v60 }
 0xa2b   : > { %v1871_v63 = vpack.c.bf16 %v1992_v61, %v1991_v62 }
 0xa2c   : > { %v1381_v15 = vpop.permute.xlu0 %1380 }
 0xa2d   : > { %1873 = vmatpush3.bf16.msk.msra.mxu0 %vm2472_vm7, %v1871_v63 }
 0xa2e   : > { %1874 = vmatprep.subr.bf16.mxu0 %v2172_v14 }
 0xa33   : > { %v2008_v1 = vpop.eup %2007 }
 0xa34   : > { %v1290_v2 = vsel %vm759_vm4, %v2008_v1, 0.0 }
 0xa35   : > { %1291 = vadd.xlane.f32.xlu1 %v1290_v2 }
 0xa46   : > { %1376 = vrot.lane.b32.xlu1 %v1021_v28, %s2180_s29 }
 0xac2   : > { %v1292_v58 = vpop.xlane.xlu1 %1291 }
 0xac3   : > { %2009 = vrcp.f32 %v1292_v58 }
 0xac6   : > { %v1377_v13 = vpop.permute.xlu1 %1376 }
 0xacd   : > { %v2010_v3 = vpop.eup %2009 }
 0xace   : > { %v1294_v5 = vmul.f32 %v2010_v3, %v2008_v1 }
 0xad0   : > { %1807 = vmatmul.mubr.msk.f32.vlgmr.msra.gmra.mrb[8].mxu0 %vm759_vm4, %v1294_v5 }
 0xad1   : > { %1817 = vmatprep.mubr.msk.f32.mxu0 %vm2173_vm1, %v2174_v20  ;;  %1876 = vmatpush3.bf16.msra.mxu0 %v1875_v8  ;;  %v1387_v20 = vsel %vm679_vm2, %v2492_v4, %v1377_v13 }
 0xad2   : > { %1877 = vmatprep.subr.bf16.mxu0 %v2172_v14  ;;  %v1389_v16 = vsel %vm1388_vm8, %v1387_v20, %v1381_v15 }
 0xad5   : > { %1879 = vmatpush3.bf16.msra.mxu0 %v1878_v10 }
 0xba3   : > { %v1371_v11 = vpop.f32.mrb[8].mxu0 }
 0xba4   : > { %1384 = vrot.lane.b32.xlu1 %v1371_v11, %s2181_s23  ;;  %v1808_v12 = vpop.f32.mrb[9].mxu0 }
 0xc16   : > { %v1385_v17 = vpop.permute.xlu1 %1384 }
 0xc17   : > { %v1391_v18 = vsel %vm1390_vm9, %v1389_v16, %v1385_v17 }
 0xc18   : > { %1818 = vmatmul.mubr.msk.f32.vlgmr.msra.gmra.mrb[10].mxu0 %vm408_vm0, %v1391_v18 }
 0xc19   : > { %2108 = shalt.err (!%p2105_p9)
}
 0xc1a   : > { %s2109_s13 = scalar_lea.hbm %s2559_s14, 512  ;;  %s2113_s27 = scalar_lea.hbm %s2621_s9, 1024 }
 0xc1b   : > { %p2110_p2 = scmp.ne.s32.totalorder %s2559_s14, %s2109_s13  ;;  %p2114_p5 = scmp.lt.u32.totalorder %s2559_s14, %s2621_s9 }
 0xc1c   : > { %p2115_p10 = scmp.lt.u32.totalorder %s2113_s27, %s2109_s13  ;;  %p2117_p12 = scmp.lt.u32.totalorder %s2109_s13, %s2559_s14 }
 0xc1d   : > { %p2111_p0 = pnand %p2110_p2, %p2649_p7 }
 0xc1e   : > { %p2116_p4 = por %p2115_p10, %p2114_p5 }
 0xc1f   : > { %p2112_p3 = pneg %p2111_p0 }
 0xc20   : > { %p2118_p8 = por %p2117_p12, %p2116_p4 }
 0xc22   : > { %p2119_p11 = pnand %p2118_p8, %p2112_p3 }
 0xc24   : > { %2122 = shalt.err (!%p2119_p11)
}
 0xc25   : > { %s2183_s24 = smov 128   ;;  %s402_s20 = scalar_lea.vmem %s2620_s8, %s1632_s21 }
 0xc26   : > { %1892 = dma.vmem_to_hbm [thread:$0]  (%p2649_p7), %s2553_s26, 512, %s2559_s14, %s2563_s16, %s2183_s24, %s2183_s24, %s2180_s29  }
 0xceb   : > { %v1465_v14 = vpop.f32.mrb[10].mxu0 }
 0xcec   : > { %v1469_v4 = vadd.f32 %v1465_v14, %v2401_v0  ;;  %v1819_v19 = vpop.f32.mrb[11].mxu0 }
 0xcee   : > { %1470 = vst.msk [vmem:[%s402_s20] sm:$0xff] %vm408_vm0, %v1469_v4 }
 0xcef PF: > { %s2650_s19 = sld [smem:[#allocation12_spill]]  ;;  %s2651_s17 = sld [smem:[#allocation16_spill]] }
 0xcf0   : > { %p1914_p13 = scmp.ge.s32.totalorder %s2165_s12, 2 }
 0xcf5   : > { %s1514_s22 = sand.u32 1, %s2650_s19   ;;  %p2652_p1 = scmp.ne.s32.totalorder %s2651_s17, 0 }
 0xcf6   : > { %s1515_s29 = scalar_lea.sflag [#allocation4], %s1514_s22 }
 0xcf7   : > { %p1905_p6 = pnand %p1914_p13, %p2652_p1 }
 0xcf9   : > { %2148 = dma.done.wait (!%p1905_p6), %s1515_s29, 512  }
 0xcfa   : > { %2150 = vsyncadd (!%p1905_p6), %s1515_s29, 4294966784  ;;  %s2653_s12 = sld [smem:[#allocation14_spill]]  ;;  %s2654_s18 = sld [smem:[#allocation13_spill]] }
 0xcfb   : > { %s2655_s11 = sld [smem:[#allocation15_spill]]  ;;  %s2656_s30 = smov %s2157_s10 }
 0xd00   : > { %p22_p7 = scmp.ge.s32.totalorder %s2653_s12, 4   ;;  %s2657_s10 = smov %s2654_s18 }
 0xd02   :  { %24 = sbr.rel (!%p22_p7) target bundleno = 5 (0x5), region = 118 }
 0xd09   :  { %1520 = vsyncpa [#allocation3], 1 }
 0xd0a   :  { %1522 = vsyncpa [#allocation3 + $0x1], 1 }
 0xd0b   :  { %1523 = vsyncpa [#allocation6], 1 }
 0xd0c   :  { %1524 = vsyncpa [#allocation4], 1 }
 0xd0d   :  { %1526 = vsyncpa [#allocation4 + $0x1], 1 }

</bundles_post_ra>
